<compile_context>
chip_gen: v5e
topology: v5e:2x2
jax: 0.10.0
libtpu: 0.0.40
codegen_flags: <defaults>
</compile_context>

<pallas_src>
import jax
import jax.numpy as jnp
from jax import lax
from jax.experimental import pallas as pl
from jax.experimental.pallas import tpu as pltpu


def _make_double_conv_kernel(N, H, W, Cin, C1, Lp1):
    """Builds the fused (conv->BN->ReLU)x2 kernel for static shapes."""
    R = N * H            # slab rows
    L2 = W * C1          # slab lanes of conv outputs (128 at the test size)
    M = N * H * W        # BN reduction size
    eps = 1e-5

    def kernel(xs_ref, w1_ref, w2_ref, pool_ref, g1_ref, b1_ref,
               g2_ref, b2_ref, o_ref):
        # Hoisted row-validity masks (depend only on the row index r = n*H + h).
        row = lax.broadcasted_iota(jnp.int32, (R, 1), 0)
        ok_up = (row % H) != 0          # valid when sourcing row h-1
        ok_dn = (row % H) != (H - 1)    # valid when sourcing row h+1

        def conv3x3(src, w_ref, c_lane, lp):
            # src: (R, lp) slab, lane index = w*c_lane + cin.
            # w_ref: (9*lp, L2) block-diagonal slab weight (per-tap blocks).
            lane = lax.broadcasted_iota(jnp.int32, (1, lp), 1)
            ok_l = lane >= c_lane                 # valid when sourcing col w-1
            ok_r = lane < (W - 1) * c_lane        # valid when sourcing col w+1
            acc = jnp.zeros((R, L2), jnp.float32)
            for k in range(9):
                dy, dx = divmod(k, 3)
                oy, ox = dy - 1, dx - 1
                t = src
                if oy != 0:
                    # sublane rotate: tap[r] = src[r + oy]
                    t = pltpu.roll(t, shift=(-oy) % R, axis=0)
                    t = jnp.where(ok_up if oy < 0 else ok_dn, t, 0.0)
                if ox != 0:
                    # lane rotate by ox*c_lane: tap[.., w] = src[.., w + ox]
                    t = pltpu.roll(t, shift=(-ox * c_lane) % lp, axis=1)
                    t = jnp.where(ok_l if ox < 0 else ok_r, t, 0.0)
                acc = acc + jnp.dot(t, w_ref[k * lp:(k + 1) * lp, :],
                                    preferred_element_type=jnp.float32)
            return acc

        def bn_relu(t, g_ref, b_ref):
            # Training-mode BatchNorm2d over (N,H,W), biased variance, two-pass.
            # Cross-lane (over-w) channel pooling rides the MXU via pool_ref;
            # the 32-row axis-0 sum is cheap.
            pool = pool_ref[...]
            mean = jnp.sum(jnp.dot(t, pool, preferred_element_type=jnp.float32),
                           axis=0, keepdims=True) * (1.0 / M)
            c = t - mean
            var = jnp.sum(jnp.dot(c * c, pool,
                                  preferred_element_type=jnp.float32),
                          axis=0, keepdims=True) * (1.0 / M)
            return jnp.maximum(
                c * (lax.rsqrt(var + eps) * g_ref[...]) + b_ref[...], 0.0)

        xs = xs_ref[...]                                    # (R, Lp1)
        y = bn_relu(conv3x3(xs, w1_ref, Cin, Lp1), g1_ref, b1_ref)   # (R, L2)
        z = bn_relu(conv3x3(y, w2_ref, C1, L2), g2_ref, b2_ref)      # (R, L2)
        o_ref[...] = z                                      # one dense store

    return kernel


def _conv_weight_slab(w, W, lp_in):
    """(3,3,Ci,Co) conv weight -> (9*lp_in, W*Co) block-diagonal slab weight.

    Row index  = k*lp_in + w*Ci + cin  (rows past W*Ci are zero padding),
    Col index  = w'*Co + cout, nonzero only for w' == w (the spatial shift is
    applied to the data via pltpu.roll, so every tap is block-diagonal in w).
    """
    _, _, Ci, Co = w.shape
    eyeW = jnp.eye(W, dtype=w.dtype)
    wk = w.reshape(9, Ci, Co)
    blk = jnp.einsum('ab,kio->kaibo', eyeW, wk)         # (9, W, Ci, W, Co)
    blk = blk.reshape(9, W * Ci, W * Co)
    blk = jnp.pad(blk, ((0, 0), (0, lp_in - W * Ci), (0, 0)))
    return blk.reshape(9 * lp_in, W * Co)


def make_inconv_params(key, in_ch, out_ch):
    ks = jax.random.split(key, 8)
    return {
        "w1": 0.1 * jax.random.normal(ks[0], (3, 3, in_ch, out_ch), jnp.float32),
        "b1": 0.1 * jax.random.normal(ks[1], (out_ch,), jnp.float32),
        "g1": 1.0 + 0.1 * jax.random.normal(ks[2], (out_ch,), jnp.float32),
        "be1": 0.1 * jax.random.normal(ks[3], (out_ch,), jnp.float32),
        "w2": 0.1 * jax.random.normal(ks[4], (3, 3, out_ch, out_ch), jnp.float32),
        "b2": 0.1 * jax.random.normal(ks[5], (out_ch,), jnp.float32),
        "g2": 1.0 + 0.1 * jax.random.normal(ks[6], (out_ch,), jnp.float32),
        "be2": 0.1 * jax.random.normal(ks[7], (out_ch,), jnp.float32),
    }


def inconv_forward(x_nchw, params):
    x = jnp.transpose(x_nchw, (0, 2, 3, 1))                 # NCHW -> NHWC
    N, H, W, Cin = x.shape
    C1 = params["w1"].shape[-1]
    R = N * H
    L1 = W * Cin
    L2 = W * C1                                             # 128 at test size
    Lp1 = max(128, -(-L1 // 128) * 128)                     # lane-pad input slab

    # Input slab (R, Lp1): row = n*H + h, lane = w*Cin + c, zero lane padding.
    xs = jnp.pad(x.reshape(R, L1), ((0, 0), (0, Lp1 - L1)))

    # Block-diagonal slab weights (conv biases intentionally not passed: they
    # cancel exactly under training-mode BN).
    w1s = _conv_weight_slab(params["w1"], W, Lp1)           # (9*Lp1, L2)
    w2s = _conv_weight_slab(params["w2"], W, L2)            # (9*L2,  L2)

    # Channel-pool matrix: pool[l', l] = 1 if l' % C1 == l % C1 (sums over w
    # and broadcasts back over w in one MXU matmul).
    li = jnp.arange(L2)
    chpool = (li[:, None] % C1 == li[None, :] % C1).astype(jnp.float32)

    # Per-channel BN affine, tiled over w to slab lanes (1, L2).
    g1l = jnp.tile(params["g1"], W).reshape(1, L2)
    b1l = jnp.tile(params["be1"], W).reshape(1, L2)
    g2l = jnp.tile(params["g2"], W).reshape(1, L2)
    b2l = jnp.tile(params["be2"], W).reshape(1, L2)

    kernel = _make_double_conv_kernel(N, H, W, Cin, C1, Lp1)

    out_slab = pl.pallas_call(
        kernel,
        out_shape=jax.ShapeDtypeStruct((R, L2), jnp.float32),
        grid=(1,),
        in_specs=[
            pl.BlockSpec((R, Lp1), lambda i: (0, 0)),
            pl.BlockSpec((9 * Lp1, L2), lambda i: (0, 0)),
            pl.BlockSpec((9 * L2, L2), lambda i: (0, 0)),
            pl.BlockSpec((L2, L2), lambda i: (0, 0)),
            pl.BlockSpec((1, L2), lambda i: (0, 0)),
            pl.BlockSpec((1, L2), lambda i: (0, 0)),
            pl.BlockSpec((1, L2), lambda i: (0, 0)),
            pl.BlockSpec((1, L2), lambda i: (0, 0)),
        ],
        out_specs=pl.BlockSpec((R, L2), lambda i: (0, 0)),
        compiler_params=pltpu.CompilerParams(
            dimension_semantics=("arbitrary",),
            # Resident footprint ~2.6 MiB; 32 MiB leaves ample headroom on
            # v5e/v6e/v7x instead of claiming all of v7x's 64 MiB VMEM.
            vmem_limit_bytes=32 * 1024 * 1024,
        ),
    )(xs, w1s, w2s, chpool, g1l, b1l, g2l, b2l)

    out = out_slab.reshape(N, H, W, C1)                     # slab -> NHWC
    return jnp.transpose(out, (0, 3, 1, 2))                 # NHWC -> NCHW


def inconv_reference(x_nchw, params):
    """Pure-JAX reference (training-mode BN semantics, includes conv bias)."""
    x = jnp.transpose(x_nchw, (0, 2, 3, 1))

    def conv(v, w, b):
        y = lax.conv_general_dilated(
            v, w, window_strides=(1, 1), padding=((1, 1), (1, 1)),
            dimension_numbers=("NHWC", "HWIO", "NHWC"))
        return y + b

    def bn_relu(y, g, b):
        mean = jnp.mean(y, axis=(0, 1, 2), keepdims=True)
        var = jnp.mean((y - mean) ** 2, axis=(0, 1, 2), keepdims=True)
        return jnp.maximum((y - mean) * lax.rsqrt(var + 1e-5) * g + b, 0.0)

    y = bn_relu(conv(x, params["w1"], params["b1"]), params["g1"], params["be1"])
    z = bn_relu(conv(y, params["w2"], params["b2"]), params["g2"], params["be2"])
    return jnp.transpose(z, (0, 3, 1, 2))


if __name__ == "__main__":
    key = jax.random.PRNGKey(0)
    kx, kp = jax.random.split(key)

    N, Cin, Cout, S = 2, 4, 8, 16
    x = jax.random.normal(kx, (N, Cin, S, S), jnp.float32)   # NCHW like PyTorch
    params = make_inconv_params(kp, Cin, Cout)

    out = jax.block_until_ready(inconv_forward(x, params))
    ref = jax.block_until_ready(inconv_reference(x, params))

    assert out.shape == (N, Cout, S, S)
    assert jnp.allclose(out, ref, atol=1e-4, rtol=1e-4), (
        float(jnp.max(jnp.abs(out - ref))))

    print("KERNEL_OK")
</pallas_src>

<mosaic_0001>
module attributes {stable_mosaic.version = 11 : i64} {
  func.func @kernel(%arg0: i32, %arg1: memref<32x128xf32, #tpu.memory_space<vmem>>, %arg2: memref<1152x128xf32, #tpu.memory_space<vmem>>, %arg3: memref<1152x128xf32, #tpu.memory_space<vmem>>, %arg4: memref<128x128xf32, #tpu.memory_space<vmem>>, %arg5: memref<1x128xf32, #tpu.memory_space<vmem>>, %arg6: memref<1x128xf32, #tpu.memory_space<vmem>>, %arg7: memref<1x128xf32, #tpu.memory_space<vmem>>, %arg8: memref<1x128xf32, #tpu.memory_space<vmem>>, %arg9: memref<32x128xf32, #tpu.memory_space<vmem>>) attributes {dimension_semantics = [#tpu.dimension_semantics<arbitrary>], iteration_bounds = array<i64: 1>, scalar_prefetch = 0 : i64, scratch_operands = 0 : i64, tpu.core_type = #tpu.core_type<tc>, window_params = [{pipeline_mode = #tpu.pipeline_mode<synchronous>, transform_indices = @transform_0, window_bounds = array<i64: 32, 128>}, {pipeline_mode = #tpu.pipeline_mode<synchronous>, transform_indices = @transform_1, window_bounds = array<i64: 1152, 128>}, {pipeline_mode = #tpu.pipeline_mode<synchronous>, transform_indices = @transform_2, window_bounds = array<i64: 1152, 128>}, {pipeline_mode = #tpu.pipeline_mode<synchronous>, transform_indices = @transform_3, window_bounds = array<i64: 128, 128>}, {pipeline_mode = #tpu.pipeline_mode<synchronous>, transform_indices = @transform_4, window_bounds = array<i64: 1, 128>}, {pipeline_mode = #tpu.pipeline_mode<synchronous>, transform_indices = @transform_5, window_bounds = array<i64: 1, 128>}, {pipeline_mode = #tpu.pipeline_mode<synchronous>, transform_indices = @transform_6, window_bounds = array<i64: 1, 128>}, {pipeline_mode = #tpu.pipeline_mode<synchronous>, transform_indices = @transform_7, window_bounds = array<i64: 1, 128>}, {pipeline_mode = #tpu.pipeline_mode<synchronous>, transform_indices = @transform_8, window_bounds = array<i64: 32, 128>}]} {
    %0 = tpu.iota {dimensions = array<i32: 0>} : vector<32x1xi32>
    %c16_i32 = arith.constant 16 : i32
    %c0_i32 = arith.constant 0 : i32
    %1 = arith.cmpi eq, %c16_i32, %c0_i32 : i32
    %c1_i32 = arith.constant 1 : i32
    %2 = arith.select %1, %c1_i32, %c16_i32 : i32
    %3 = vector.broadcast %2 : i32 to vector<32x1xi32>
    %4 = arith.remsi %0, %3 : vector<32x1xi32>
    %c0_i32_0 = arith.constant 0 : i32
    %5 = vector.broadcast %c0_i32_0 : i32 to vector<32x1xi32>
    %6 = arith.cmpi ne, %4, %5 : vector<32x1xi32>
    %c0_i32_1 = arith.constant 0 : i32
    %7 = vector.broadcast %c0_i32_1 : i32 to vector<32x1xi32>
    %8 = arith.cmpi slt, %4, %7 : vector<32x1xi32>
    %c0_i32_2 = arith.constant 0 : i32
    %9 = arith.cmpi slt, %2, %c0_i32_2 : i32
    %10 = vector.broadcast %9 : i1 to vector<32x1xi1>
    %11 = vector.broadcast %10 : vector<32x1xi1> to vector<32x1xi1>
    %12 = arith.xori %8, %11 : vector<32x1xi1>
    %13 = arith.andi %12, %6 : vector<32x1xi1>
    %14 = vector.broadcast %2 : i32 to vector<32x1xi32>
    %15 = arith.addi %4, %14 : vector<32x1xi32>
    %16 = arith.select %13, %15, %4 : vector<32x1xi1>, vector<32x1xi32>
    %c0_i32_3 = arith.constant 0 : i32
    %17 = vector.broadcast %c0_i32_3 : i32 to vector<32x1xi32>
    %18 = arith.cmpi ne, %16, %17 : vector<32x1xi32>
    %c16_i32_4 = arith.constant 16 : i32
    %c0_i32_5 = arith.constant 0 : i32
    %19 = arith.cmpi eq, %c16_i32_4, %c0_i32_5 : i32
    %c1_i32_6 = arith.constant 1 : i32
    %20 = arith.select %19, %c1_i32_6, %c16_i32_4 : i32
    %21 = vector.broadcast %20 : i32 to vector<32x1xi32>
    %22 = arith.remsi %0, %21 : vector<32x1xi32>
    %c0_i32_7 = arith.constant 0 : i32
    %23 = vector.broadcast %c0_i32_7 : i32 to vector<32x1xi32>
    %24 = arith.cmpi ne, %22, %23 : vector<32x1xi32>
    %c0_i32_8 = arith.constant 0 : i32
    %25 = vector.broadcast %c0_i32_8 : i32 to vector<32x1xi32>
    %26 = arith.cmpi slt, %22, %25 : vector<32x1xi32>
    %c0_i32_9 = arith.constant 0 : i32
    %27 = arith.cmpi slt, %20, %c0_i32_9 : i32
    %28 = vector.broadcast %27 : i1 to vector<32x1xi1>
    %29 = vector.broadcast %28 : vector<32x1xi1> to vector<32x1xi1>
    %30 = arith.xori %26, %29 : vector<32x1xi1>
    %31 = arith.andi %30, %24 : vector<32x1xi1>
    %32 = vector.broadcast %20 : i32 to vector<32x1xi32>
    %33 = arith.addi %22, %32 : vector<32x1xi32>
    %34 = arith.select %31, %33, %22 : vector<32x1xi1>, vector<32x1xi32>
    %c15_i32 = arith.constant 15 : i32
    %35 = vector.broadcast %c15_i32 : i32 to vector<32x1xi32>
    %36 = arith.cmpi ne, %34, %35 : vector<32x1xi32>
    %c0 = arith.constant 0 : index
    %c0_10 = arith.constant 0 : index
    %37 = vector.load %arg1[%c0, %c0_10] : memref<32x128xf32, #tpu.memory_space<vmem>>, vector<32x128xf32>
    %38 = tpu.iota {dimensions = array<i32: 1>} : vector<1x128xi32>
    %c4_i32 = arith.constant 4 : i32
    %39 = vector.broadcast %c4_i32 : i32 to vector<1x128xi32>
    %40 = arith.cmpi sge, %38, %39 : vector<1x128xi32>
    %c60_i32 = arith.constant 60 : i32
    %41 = vector.broadcast %c60_i32 : i32 to vector<1x128xi32>
    %42 = arith.cmpi slt, %38, %41 : vector<1x128xi32>
    %cst = arith.constant 0.000000e+00 : f32
    %43 = vector.broadcast %cst : f32 to vector<32x128xf32>
    %c1_i32_11 = arith.constant 1 : i32
    %44 = tpu.dynamic_rotate %37 by %c1_i32_11 dim 0 : vector<32x128xf32>, i32 -> vector<32x128xf32>
    %cst_12 = arith.constant 0.000000e+00 : f32
    %45 = vector.shape_cast %18 : vector<32x1xi1> to vector<32x1xi1>
    %46 = vector.broadcast %45 : vector<32x1xi1> to vector<32x128xi1>
    %47 = vector.broadcast %cst_12 : f32 to vector<32x128xf32>
    %48 = arith.select %46, %44, %47 : vector<32x128xi1>, vector<32x128xf32>
    %c4_i32_13 = arith.constant 4 : i32
    %49 = tpu.dynamic_rotate %48 by %c4_i32_13 dim 1 : vector<32x128xf32>, i32 -> vector<32x128xf32>
    %cst_14 = arith.constant 0.000000e+00 : f32
    %50 = vector.shape_cast %40 : vector<1x128xi1> to vector<1x128xi1>
    %51 = vector.broadcast %50 : vector<1x128xi1> to vector<32x128xi1>
    %52 = vector.broadcast %cst_14 : f32 to vector<32x128xf32>
    %53 = arith.select %51, %49, %52 : vector<32x128xi1>, vector<32x128xf32>
    %c0_15 = arith.constant 0 : index
    %c0_16 = arith.constant 0 : index
    %54 = vector.load %arg2[%c0_15, %c0_16] : memref<1152x128xf32, #tpu.memory_space<vmem>>, vector<128x128xf32>
    %cst_17 = arith.constant dense<0.000000e+00> : vector<32x128xf32>
    %55 = tpu.matmul %53, %54, %cst_17 {dimension_numbers = #tpu.dot_dimension_numbers<[1], [0], [0], [1], [0, 0, 1, 1], [], []>} : vector<32x128xf32>, vector<128x128xf32>, vector<32x128xf32> -> vector<32x128xf32>
    %56 = arith.addf %43, %55 : vector<32x128xf32>
    %c1_i32_18 = arith.constant 1 : i32
    %57 = tpu.dynamic_rotate %37 by %c1_i32_18 dim 0 : vector<32x128xf32>, i32 -> vector<32x128xf32>
    %cst_19 = arith.constant 0.000000e+00 : f32
    %58 = vector.shape_cast %18 : vector<32x1xi1> to vector<32x1xi1>
    %59 = vector.broadcast %58 : vector<32x1xi1> to vector<32x128xi1>
    %60 = vector.broadcast %cst_19 : f32 to vector<32x128xf32>
    %61 = arith.select %59, %57, %60 : vector<32x128xi1>, vector<32x128xf32>
    %c128 = arith.constant 128 : index
    %c0_20 = arith.constant 0 : index
    %62 = vector.load %arg2[%c128, %c0_20] : memref<1152x128xf32, #tpu.memory_space<vmem>>, vector<128x128xf32>
    %cst_21 = arith.constant dense<0.000000e+00> : vector<32x128xf32>
    %63 = tpu.matmul %61, %62, %cst_21 {dimension_numbers = #tpu.dot_dimension_numbers<[1], [0], [0], [1], [0, 0, 1, 1], [], []>} : vector<32x128xf32>, vector<128x128xf32>, vector<32x128xf32> -> vector<32x128xf32>
    %64 = arith.addf %56, %63 : vector<32x128xf32>
    %c1_i32_22 = arith.constant 1 : i32
    %65 = tpu.dynamic_rotate %37 by %c1_i32_22 dim 0 : vector<32x128xf32>, i32 -> vector<32x128xf32>
    %cst_23 = arith.constant 0.000000e+00 : f32
    %66 = vector.shape_cast %18 : vector<32x1xi1> to vector<32x1xi1>
    %67 = vector.broadcast %66 : vector<32x1xi1> to vector<32x128xi1>
    %68 = vector.broadcast %cst_23 : f32 to vector<32x128xf32>
    %69 = arith.select %67, %65, %68 : vector<32x128xi1>, vector<32x128xf32>
    %c124_i32 = arith.constant 124 : i32
    %70 = tpu.dynamic_rotate %69 by %c124_i32 dim 1 : vector<32x128xf32>, i32 -> vector<32x128xf32>
    %cst_24 = arith.constant 0.000000e+00 : f32
    %71 = vector.shape_cast %42 : vector<1x128xi1> to vector<1x128xi1>
    %72 = vector.broadcast %71 : vector<1x128xi1> to vector<32x128xi1>
    %73 = vector.broadcast %cst_24 : f32 to vector<32x128xf32>
    %74 = arith.select %72, %70, %73 : vector<32x128xi1>, vector<32x128xf32>
    %c256 = arith.constant 256 : index
    %c0_25 = arith.constant 0 : index
    %75 = vector.load %arg2[%c256, %c0_25] : memref<1152x128xf32, #tpu.memory_space<vmem>>, vector<128x128xf32>
    %cst_26 = arith.constant dense<0.000000e+00> : vector<32x128xf32>
    %76 = tpu.matmul %74, %75, %cst_26 {dimension_numbers = #tpu.dot_dimension_numbers<[1], [0], [0], [1], [0, 0, 1, 1], [], []>} : vector<32x128xf32>, vector<128x128xf32>, vector<32x128xf32> -> vector<32x128xf32>
    %77 = arith.addf %64, %76 : vector<32x128xf32>
    %c4_i32_27 = arith.constant 4 : i32
    %78 = tpu.dynamic_rotate %37 by %c4_i32_27 dim 1 : vector<32x128xf32>, i32 -> vector<32x128xf32>
    %cst_28 = arith.constant 0.000000e+00 : f32
    %79 = vector.shape_cast %40 : vector<1x128xi1> to vector<1x128xi1>
    %80 = vector.broadcast %79 : vector<1x128xi1> to vector<32x128xi1>
    %81 = vector.broadcast %cst_28 : f32 to vector<32x128xf32>
    %82 = arith.select %80, %78, %81 : vector<32x128xi1>, vector<32x128xf32>
    %c384 = arith.constant 384 : index
    %c0_29 = arith.constant 0 : index
    %83 = vector.load %arg2[%c384, %c0_29] : memref<1152x128xf32, #tpu.memory_space<vmem>>, vector<128x128xf32>
    %cst_30 = arith.constant dense<0.000000e+00> : vector<32x128xf32>
    %84 = tpu.matmul %82, %83, %cst_30 {dimension_numbers = #tpu.dot_dimension_numbers<[1], [0], [0], [1], [0, 0, 1, 1], [], []>} : vector<32x128xf32>, vector<128x128xf32>, vector<32x128xf32> -> vector<32x128xf32>
    %85 = arith.addf %77, %84 : vector<32x128xf32>
    %c512 = arith.constant 512 : index
    %c0_31 = arith.constant 0 : index
    %86 = vector.load %arg2[%c512, %c0_31] : memref<1152x128xf32, #tpu.memory_space<vmem>>, vector<128x128xf32>
    %cst_32 = arith.constant dense<0.000000e+00> : vector<32x128xf32>
    %87 = tpu.matmul %37, %86, %cst_32 {dimension_numbers = #tpu.dot_dimension_numbers<[1], [0], [0], [1], [0, 0, 1, 1], [], []>} : vector<32x128xf32>, vector<128x128xf32>, vector<32x128xf32> -> vector<32x128xf32>
    %88 = arith.addf %85, %87 : vector<32x128xf32>
    %c124_i32_33 = arith.constant 124 : i32
    %89 = tpu.dynamic_rotate %37 by %c124_i32_33 dim 1 : vector<32x128xf32>, i32 -> vector<32x128xf32>
    %cst_34 = arith.constant 0.000000e+00 : f32
    %90 = vector.shape_cast %42 : vector<1x128xi1> to vector<1x128xi1>
    %91 = vector.broadcast %90 : vector<1x128xi1> to vector<32x128xi1>
    %92 = vector.broadcast %cst_34 : f32 to vector<32x128xf32>
    %93 = arith.select %91, %89, %92 : vector<32x128xi1>, vector<32x128xf32>
    %c640 = arith.constant 640 : index
    %c0_35 = arith.constant 0 : index
    %94 = vector.load %arg2[%c640, %c0_35] : memref<1152x128xf32, #tpu.memory_space<vmem>>, vector<128x128xf32>
    %cst_36 = arith.constant dense<0.000000e+00> : vector<32x128xf32>
    %95 = tpu.matmul %93, %94, %cst_36 {dimension_numbers = #tpu.dot_dimension_numbers<[1], [0], [0], [1], [0, 0, 1, 1], [], []>} : vector<32x128xf32>, vector<128x128xf32>, vector<32x128xf32> -> vector<32x128xf32>
    %96 = arith.addf %88, %95 : vector<32x128xf32>
    %c31_i32 = arith.constant 31 : i32
    %97 = tpu.dynamic_rotate %37 by %c31_i32 dim 0 : vector<32x128xf32>, i32 -> vector<32x128xf32>
    %cst_37 = arith.constant 0.000000e+00 : f32
    %98 = vector.shape_cast %36 : vector<32x1xi1> to vector<32x1xi1>
    %99 = vector.broadcast %98 : vector<32x1xi1> to vector<32x128xi1>
    %100 = vector.broadcast %cst_37 : f32 to vector<32x128xf32>
    %101 = arith.select %99, %97, %100 : vector<32x128xi1>, vector<32x128xf32>
    %c4_i32_38 = arith.constant 4 : i32
    %102 = tpu.dynamic_rotate %101 by %c4_i32_38 dim 1 : vector<32x128xf32>, i32 -> vector<32x128xf32>
    %cst_39 = arith.constant 0.000000e+00 : f32
    %103 = vector.shape_cast %40 : vector<1x128xi1> to vector<1x128xi1>
    %104 = vector.broadcast %103 : vector<1x128xi1> to vector<32x128xi1>
    %105 = vector.broadcast %cst_39 : f32 to vector<32x128xf32>
    %106 = arith.select %104, %102, %105 : vector<32x128xi1>, vector<32x128xf32>
    %c768 = arith.constant 768 : index
    %c0_40 = arith.constant 0 : index
    %107 = vector.load %arg2[%c768, %c0_40] : memref<1152x128xf32, #tpu.memory_space<vmem>>, vector<128x128xf32>
    %cst_41 = arith.constant dense<0.000000e+00> : vector<32x128xf32>
    %108 = tpu.matmul %106, %107, %cst_41 {dimension_numbers = #tpu.dot_dimension_numbers<[1], [0], [0], [1], [0, 0, 1, 1], [], []>} : vector<32x128xf32>, vector<128x128xf32>, vector<32x128xf32> -> vector<32x128xf32>
    %109 = arith.addf %96, %108 : vector<32x128xf32>
    %c31_i32_42 = arith.constant 31 : i32
    %110 = tpu.dynamic_rotate %37 by %c31_i32_42 dim 0 : vector<32x128xf32>, i32 -> vector<32x128xf32>
    %cst_43 = arith.constant 0.000000e+00 : f32
    %111 = vector.shape_cast %36 : vector<32x1xi1> to vector<32x1xi1>
    %112 = vector.broadcast %111 : vector<32x1xi1> to vector<32x128xi1>
    %113 = vector.broadcast %cst_43 : f32 to vector<32x128xf32>
    %114 = arith.select %112, %110, %113 : vector<32x128xi1>, vector<32x128xf32>
    %c896 = arith.constant 896 : index
    %c0_44 = arith.constant 0 : index
    %115 = vector.load %arg2[%c896, %c0_44] : memref<1152x128xf32, #tpu.memory_space<vmem>>, vector<128x128xf32>
    %cst_45 = arith.constant dense<0.000000e+00> : vector<32x128xf32>
    %116 = tpu.matmul %114, %115, %cst_45 {dimension_numbers = #tpu.dot_dimension_numbers<[1], [0], [0], [1], [0, 0, 1, 1], [], []>} : vector<32x128xf32>, vector<128x128xf32>, vector<32x128xf32> -> vector<32x128xf32>
    %117 = arith.addf %109, %116 : vector<32x128xf32>
    %c31_i32_46 = arith.constant 31 : i32
    %118 = tpu.dynamic_rotate %37 by %c31_i32_46 dim 0 : vector<32x128xf32>, i32 -> vector<32x128xf32>
    %cst_47 = arith.constant 0.000000e+00 : f32
    %119 = vector.shape_cast %36 : vector<32x1xi1> to vector<32x1xi1>
    %120 = vector.broadcast %119 : vector<32x1xi1> to vector<32x128xi1>
    %121 = vector.broadcast %cst_47 : f32 to vector<32x128xf32>
    %122 = arith.select %120, %118, %121 : vector<32x128xi1>, vector<32x128xf32>
    %c124_i32_48 = arith.constant 124 : i32
    %123 = tpu.dynamic_rotate %122 by %c124_i32_48 dim 1 : vector<32x128xf32>, i32 -> vector<32x128xf32>
    %cst_49 = arith.constant 0.000000e+00 : f32
    %124 = vector.shape_cast %42 : vector<1x128xi1> to vector<1x128xi1>
    %125 = vector.broadcast %124 : vector<1x128xi1> to vector<32x128xi1>
    %126 = vector.broadcast %cst_49 : f32 to vector<32x128xf32>
    %127 = arith.select %125, %123, %126 : vector<32x128xi1>, vector<32x128xf32>
    %c1024 = arith.constant 1024 : index
    %c0_50 = arith.constant 0 : index
    %128 = vector.load %arg2[%c1024, %c0_50] : memref<1152x128xf32, #tpu.memory_space<vmem>>, vector<128x128xf32>
    %cst_51 = arith.constant dense<0.000000e+00> : vector<32x128xf32>
    %129 = tpu.matmul %127, %128, %cst_51 {dimension_numbers = #tpu.dot_dimension_numbers<[1], [0], [0], [1], [0, 0, 1, 1], [], []>} : vector<32x128xf32>, vector<128x128xf32>, vector<32x128xf32> -> vector<32x128xf32>
    %130 = arith.addf %117, %129 : vector<32x128xf32>
    %c0_52 = arith.constant 0 : index
    %c0_53 = arith.constant 0 : index
    %131 = vector.load %arg4[%c0_52, %c0_53] : memref<128x128xf32, #tpu.memory_space<vmem>>, vector<128x128xf32>
    %cst_54 = arith.constant dense<0.000000e+00> : vector<32x128xf32>
    %132 = tpu.matmul %130, %131, %cst_54 {dimension_numbers = #tpu.dot_dimension_numbers<[1], [0], [0], [1], [0, 0, 1, 1], [], []>} : vector<32x128xf32>, vector<128x128xf32>, vector<32x128xf32> -> vector<32x128xf32>
    %cst_55 = arith.constant dense<0.000000e+00> : vector<128xf32>
    %133 = vector.multi_reduction <add>, %132, %cst_55 [0] : vector<32x128xf32> to vector<128xf32>
    %134 = vector.shape_cast %133 : vector<128xf32> to vector<1x128xf32>
    %cst_56 = arith.constant 0.001953125 : f32
    %135 = vector.broadcast %cst_56 : f32 to vector<1x128xf32>
    %136 = arith.mulf %134, %135 : vector<1x128xf32>
    %137 = vector.broadcast %136 : vector<1x128xf32> to vector<32x128xf32>
    %138 = arith.subf %130, %137 : vector<32x128xf32>
    %139 = arith.mulf %138, %138 : vector<32x128xf32>
    %cst_57 = arith.constant dense<0.000000e+00> : vector<32x128xf32>
    %140 = tpu.matmul %139, %131, %cst_57 {dimension_numbers = #tpu.dot_dimension_numbers<[1], [0], [0], [1], [0, 0, 1, 1], [], []>} : vector<32x128xf32>, vector<128x128xf32>, vector<32x128xf32> -> vector<32x128xf32>
    %cst_58 = arith.constant dense<0.000000e+00> : vector<128xf32>
    %141 = vector.multi_reduction <add>, %140, %cst_58 [0] : vector<32x128xf32> to vector<128xf32>
    %142 = vector.shape_cast %141 : vector<128xf32> to vector<1x128xf32>
    %cst_59 = arith.constant 0.001953125 : f32
    %143 = vector.broadcast %cst_59 : f32 to vector<1x128xf32>
    %144 = arith.mulf %142, %143 : vector<1x128xf32>
    %cst_60 = arith.constant 9.99999974E-6 : f32
    %145 = vector.broadcast %cst_60 : f32 to vector<1x128xf32>
    %146 = arith.addf %144, %145 : vector<1x128xf32>
    %147 = math.rsqrt %146 : vector<1x128xf32>
    %c0_61 = arith.constant 0 : index
    %c0_62 = arith.constant 0 : index
    %148 = vector.load %arg5[%c0_61, %c0_62] : memref<1x128xf32, #tpu.memory_space<vmem>>, vector<1x128xf32>
    %149 = arith.mulf %147, %148 : vector<1x128xf32>
    %150 = vector.broadcast %149 : vector<1x128xf32> to vector<32x128xf32>
    %151 = arith.mulf %138, %150 : vector<32x128xf32>
    %c0_63 = arith.constant 0 : index
    %c0_64 = arith.constant 0 : index
    %152 = vector.load %arg6[%c0_63, %c0_64] : memref<1x128xf32, #tpu.memory_space<vmem>>, vector<1x128xf32>
    %153 = vector.broadcast %152 : vector<1x128xf32> to vector<32x128xf32>
    %154 = arith.addf %151, %153 : vector<32x128xf32>
    %cst_65 = arith.constant 0.000000e+00 : f32
    %155 = vector.broadcast %cst_65 : f32 to vector<32x128xf32>
    %156 = arith.maximumf %154, %155 : vector<32x128xf32>
    %157 = tpu.iota {dimensions = array<i32: 1>} : vector<1x128xi32>
    %c8_i32 = arith.constant 8 : i32
    %158 = vector.broadcast %c8_i32 : i32 to vector<1x128xi32>
    %159 = arith.cmpi sge, %157, %158 : vector<1x128xi32>
    %c120_i32 = arith.constant 120 : i32
    %160 = vector.broadcast %c120_i32 : i32 to vector<1x128xi32>
    %161 = arith.cmpi slt, %157, %160 : vector<1x128xi32>
    %cst_66 = arith.constant 0.000000e+00 : f32
    %162 = vector.broadcast %cst_66 : f32 to vector<32x128xf32>
    %c1_i32_67 = arith.constant 1 : i32
    %163 = tpu.dynamic_rotate %156 by %c1_i32_67 dim 0 : vector<32x128xf32>, i32 -> vector<32x128xf32>
    %cst_68 = arith.constant 0.000000e+00 : f32
    %164 = vector.shape_cast %18 : vector<32x1xi1> to vector<32x1xi1>
    %165 = vector.broadcast %164 : vector<32x1xi1> to vector<32x128xi1>
    %166 = vector.broadcast %cst_68 : f32 to vector<32x128xf32>
    %167 = arith.select %165, %163, %166 : vector<32x128xi1>, vector<32x128xf32>
    %c8_i32_69 = arith.constant 8 : i32
    %168 = tpu.dynamic_rotate %167 by %c8_i32_69 dim 1 : vector<32x128xf32>, i32 -> vector<32x128xf32>
    %cst_70 = arith.constant 0.000000e+00 : f32
    %169 = vector.shape_cast %159 : vector<1x128xi1> to vector<1x128xi1>
    %170 = vector.broadcast %169 : vector<1x128xi1> to vector<32x128xi1>
    %171 = vector.broadcast %cst_70 : f32 to vector<32x128xf32>
    %172 = arith.select %170, %168, %171 : vector<32x128xi1>, vector<32x128xf32>
    %c0_71 = arith.constant 0 : index
    %c0_72 = arith.constant 0 : index
    %173 = vector.load %arg3[%c0_71, %c0_72] : memref<1152x128xf32, #tpu.memory_space<vmem>>, vector<128x128xf32>
    %cst_73 = arith.constant dense<0.000000e+00> : vector<32x128xf32>
    %174 = tpu.matmul %172, %173, %cst_73 {dimension_numbers = #tpu.dot_dimension_numbers<[1], [0], [0], [1], [0, 0, 1, 1], [], []>} : vector<32x128xf32>, vector<128x128xf32>, vector<32x128xf32> -> vector<32x128xf32>
    %175 = arith.addf %162, %174 : vector<32x128xf32>
    %c1_i32_74 = arith.constant 1 : i32
    %176 = tpu.dynamic_rotate %156 by %c1_i32_74 dim 0 : vector<32x128xf32>, i32 -> vector<32x128xf32>
    %cst_75 = arith.constant 0.000000e+00 : f32
    %177 = vector.shape_cast %18 : vector<32x1xi1> to vector<32x1xi1>
    %178 = vector.broadcast %177 : vector<32x1xi1> to vector<32x128xi1>
    %179 = vector.broadcast %cst_75 : f32 to vector<32x128xf32>
    %180 = arith.select %178, %176, %179 : vector<32x128xi1>, vector<32x128xf32>
    %c128_76 = arith.constant 128 : index
    %c0_77 = arith.constant 0 : index
    %181 = vector.load %arg3[%c128_76, %c0_77] : memref<1152x128xf32, #tpu.memory_space<vmem>>, vector<128x128xf32>
    %cst_78 = arith.constant dense<0.000000e+00> : vector<32x128xf32>
    %182 = tpu.matmul %180, %181, %cst_78 {dimension_numbers = #tpu.dot_dimension_numbers<[1], [0], [0], [1], [0, 0, 1, 1], [], []>} : vector<32x128xf32>, vector<128x128xf32>, vector<32x128xf32> -> vector<32x128xf32>
    %183 = arith.addf %175, %182 : vector<32x128xf32>
    %c1_i32_79 = arith.constant 1 : i32
    %184 = tpu.dynamic_rotate %156 by %c1_i32_79 dim 0 : vector<32x128xf32>, i32 -> vector<32x128xf32>
    %cst_80 = arith.constant 0.000000e+00 : f32
    %185 = vector.shape_cast %18 : vector<32x1xi1> to vector<32x1xi1>
    %186 = vector.broadcast %185 : vector<32x1xi1> to vector<32x128xi1>
    %187 = vector.broadcast %cst_80 : f32 to vector<32x128xf32>
    %188 = arith.select %186, %184, %187 : vector<32x128xi1>, vector<32x128xf32>
    %c120_i32_81 = arith.constant 120 : i32
    %189 = tpu.dynamic_rotate %188 by %c120_i32_81 dim 1 : vector<32x128xf32>, i32 -> vector<32x128xf32>
    %cst_82 = arith.constant 0.000000e+00 : f32
    %190 = vector.shape_cast %161 : vector<1x128xi1> to vector<1x128xi1>
    %191 = vector.broadcast %190 : vector<1x128xi1> to vector<32x128xi1>
    %192 = vector.broadcast %cst_82 : f32 to vector<32x128xf32>
    %193 = arith.select %191, %189, %192 : vector<32x128xi1>, vector<32x128xf32>
    %c256_83 = arith.constant 256 : index
    %c0_84 = arith.constant 0 : index
    %194 = vector.load %arg3[%c256_83, %c0_84] : memref<1152x128xf32, #tpu.memory_space<vmem>>, vector<128x128xf32>
    %cst_85 = arith.constant dense<0.000000e+00> : vector<32x128xf32>
    %195 = tpu.matmul %193, %194, %cst_85 {dimension_numbers = #tpu.dot_dimension_numbers<[1], [0], [0], [1], [0, 0, 1, 1], [], []>} : vector<32x128xf32>, vector<128x128xf32>, vector<32x128xf32> -> vector<32x128xf32>
    %196 = arith.addf %183, %195 : vector<32x128xf32>
    %c8_i32_86 = arith.constant 8 : i32
    %197 = tpu.dynamic_rotate %156 by %c8_i32_86 dim 1 : vector<32x128xf32>, i32 -> vector<32x128xf32>
    %cst_87 = arith.constant 0.000000e+00 : f32
    %198 = vector.shape_cast %159 : vector<1x128xi1> to vector<1x128xi1>
    %199 = vector.broadcast %198 : vector<1x128xi1> to vector<32x128xi1>
    %200 = vector.broadcast %cst_87 : f32 to vector<32x128xf32>
    %201 = arith.select %199, %197, %200 : vector<32x128xi1>, vector<32x128xf32>
    %c384_88 = arith.constant 384 : index
    %c0_89 = arith.constant 0 : index
    %202 = vector.load %arg3[%c384_88, %c0_89] : memref<1152x128xf32, #tpu.memory_space<vmem>>, vector<128x128xf32>
    %cst_90 = arith.constant dense<0.000000e+00> : vector<32x128xf32>
    %203 = tpu.matmul %201, %202, %cst_90 {dimension_numbers = #tpu.dot_dimension_numbers<[1], [0], [0], [1], [0, 0, 1, 1], [], []>} : vector<32x128xf32>, vector<128x128xf32>, vector<32x128xf32> -> vector<32x128xf32>
    %204 = arith.addf %196, %203 : vector<32x128xf32>
    %c512_91 = arith.constant 512 : index
    %c0_92 = arith.constant 0 : index
    %205 = vector.load %arg3[%c512_91, %c0_92] : memref<1152x128xf32, #tpu.memory_space<vmem>>, vector<128x128xf32>
    %cst_93 = arith.constant dense<0.000000e+00> : vector<32x128xf32>
    %206 = tpu.matmul %156, %205, %cst_93 {dimension_numbers = #tpu.dot_dimension_numbers<[1], [0], [0], [1], [0, 0, 1, 1], [], []>} : vector<32x128xf32>, vector<128x128xf32>, vector<32x128xf32> -> vector<32x128xf32>
    %207 = arith.addf %204, %206 : vector<32x128xf32>
    %c120_i32_94 = arith.constant 120 : i32
    %208 = tpu.dynamic_rotate %156 by %c120_i32_94 dim 1 : vector<32x128xf32>, i32 -> vector<32x128xf32>
    %cst_95 = arith.constant 0.000000e+00 : f32
    %209 = vector.shape_cast %161 : vector<1x128xi1> to vector<1x128xi1>
    %210 = vector.broadcast %209 : vector<1x128xi1> to vector<32x128xi1>
    %211 = vector.broadcast %cst_95 : f32 to vector<32x128xf32>
    %212 = arith.select %210, %208, %211 : vector<32x128xi1>, vector<32x128xf32>
    %c640_96 = arith.constant 640 : index
    %c0_97 = arith.constant 0 : index
    %213 = vector.load %arg3[%c640_96, %c0_97] : memref<1152x128xf32, #tpu.memory_space<vmem>>, vector<128x128xf32>
    %cst_98 = arith.constant dense<0.000000e+00> : vector<32x128xf32>
    %214 = tpu.matmul %212, %213, %cst_98 {dimension_numbers = #tpu.dot_dimension_numbers<[1], [0], [0], [1], [0, 0, 1, 1], [], []>} : vector<32x128xf32>, vector<128x128xf32>, vector<32x128xf32> -> vector<32x128xf32>
    %215 = arith.addf %207, %214 : vector<32x128xf32>
    %c31_i32_99 = arith.constant 31 : i32
    %216 = tpu.dynamic_rotate %156 by %c31_i32_99 dim 0 : vector<32x128xf32>, i32 -> vector<32x128xf32>
    %cst_100 = arith.constant 0.000000e+00 : f32
    %217 = vector.shape_cast %36 : vector<32x1xi1> to vector<32x1xi1>
    %218 = vector.broadcast %217 : vector<32x1xi1> to vector<32x128xi1>
    %219 = vector.broadcast %cst_100 : f32 to vector<32x128xf32>
    %220 = arith.select %218, %216, %219 : vector<32x128xi1>, vector<32x128xf32>
    %c8_i32_101 = arith.constant 8 : i32
    %221 = tpu.dynamic_rotate %220 by %c8_i32_101 dim 1 : vector<32x128xf32>, i32 -> vector<32x128xf32>
    %cst_102 = arith.constant 0.000000e+00 : f32
    %222 = vector.shape_cast %159 : vector<1x128xi1> to vector<1x128xi1>
    %223 = vector.broadcast %222 : vector<1x128xi1> to vector<32x128xi1>
    %224 = vector.broadcast %cst_102 : f32 to vector<32x128xf32>
    %225 = arith.select %223, %221, %224 : vector<32x128xi1>, vector<32x128xf32>
    %c768_103 = arith.constant 768 : index
    %c0_104 = arith.constant 0 : index
    %226 = vector.load %arg3[%c768_103, %c0_104] : memref<1152x128xf32, #tpu.memory_space<vmem>>, vector<128x128xf32>
    %cst_105 = arith.constant dense<0.000000e+00> : vector<32x128xf32>
    %227 = tpu.matmul %225, %226, %cst_105 {dimension_numbers = #tpu.dot_dimension_numbers<[1], [0], [0], [1], [0, 0, 1, 1], [], []>} : vector<32x128xf32>, vector<128x128xf32>, vector<32x128xf32> -> vector<32x128xf32>
    %228 = arith.addf %215, %227 : vector<32x128xf32>
    %c31_i32_106 = arith.constant 31 : i32
    %229 = tpu.dynamic_rotate %156 by %c31_i32_106 dim 0 : vector<32x128xf32>, i32 -> vector<32x128xf32>
    %cst_107 = arith.constant 0.000000e+00 : f32
    %230 = vector.shape_cast %36 : vector<32x1xi1> to vector<32x1xi1>
    %231 = vector.broadcast %230 : vector<32x1xi1> to vector<32x128xi1>
    %232 = vector.broadcast %cst_107 : f32 to vector<32x128xf32>
    %233 = arith.select %231, %229, %232 : vector<32x128xi1>, vector<32x128xf32>
    %c896_108 = arith.constant 896 : index
    %c0_109 = arith.constant 0 : index
    %234 = vector.load %arg3[%c896_108, %c0_109] : memref<1152x128xf32, #tpu.memory_space<vmem>>, vector<128x128xf32>
    %cst_110 = arith.constant dense<0.000000e+00> : vector<32x128xf32>
    %235 = tpu.matmul %233, %234, %cst_110 {dimension_numbers = #tpu.dot_dimension_numbers<[1], [0], [0], [1], [0, 0, 1, 1], [], []>} : vector<32x128xf32>, vector<128x128xf32>, vector<32x128xf32> -> vector<32x128xf32>
    %236 = arith.addf %228, %235 : vector<32x128xf32>
    %c31_i32_111 = arith.constant 31 : i32
    %237 = tpu.dynamic_rotate %156 by %c31_i32_111 dim 0 : vector<32x128xf32>, i32 -> vector<32x128xf32>
    %cst_112 = arith.constant 0.000000e+00 : f32
    %238 = vector.shape_cast %36 : vector<32x1xi1> to vector<32x1xi1>
    %239 = vector.broadcast %238 : vector<32x1xi1> to vector<32x128xi1>
    %240 = vector.broadcast %cst_112 : f32 to vector<32x128xf32>
    %241 = arith.select %239, %237, %240 : vector<32x128xi1>, vector<32x128xf32>
    %c120_i32_113 = arith.constant 120 : i32
    %242 = tpu.dynamic_rotate %241 by %c120_i32_113 dim 1 : vector<32x128xf32>, i32 -> vector<32x128xf32>
    %cst_114 = arith.constant 0.000000e+00 : f32
    %243 = vector.shape_cast %161 : vector<1x128xi1> to vector<1x128xi1>
    %244 = vector.broadcast %243 : vector<1x128xi1> to vector<32x128xi1>
    %245 = vector.broadcast %cst_114 : f32 to vector<32x128xf32>
    %246 = arith.select %244, %242, %245 : vector<32x128xi1>, vector<32x128xf32>
    %c1024_115 = arith.constant 1024 : index
    %c0_116 = arith.constant 0 : index
    %247 = vector.load %arg3[%c1024_115, %c0_116] : memref<1152x128xf32, #tpu.memory_space<vmem>>, vector<128x128xf32>
    %cst_117 = arith.constant dense<0.000000e+00> : vector<32x128xf32>
    %248 = tpu.matmul %246, %247, %cst_117 {dimension_numbers = #tpu.dot_dimension_numbers<[1], [0], [0], [1], [0, 0, 1, 1], [], []>} : vector<32x128xf32>, vector<128x128xf32>, vector<32x128xf32> -> vector<32x128xf32>
    %249 = arith.addf %236, %248 : vector<32x128xf32>
    %c0_118 = arith.constant 0 : index
    %c0_119 = arith.constant 0 : index
    %250 = vector.load %arg4[%c0_118, %c0_119] : memref<128x128xf32, #tpu.memory_space<vmem>>, vector<128x128xf32>
    %cst_120 = arith.constant dense<0.000000e+00> : vector<32x128xf32>
    %251 = tpu.matmul %249, %250, %cst_120 {dimension_numbers = #tpu.dot_dimension_numbers<[1], [0], [0], [1], [0, 0, 1, 1], [], []>} : vector<32x128xf32>, vector<128x128xf32>, vector<32x128xf32> -> vector<32x128xf32>
    %cst_121 = arith.constant dense<0.000000e+00> : vector<128xf32>
    %252 = vector.multi_reduction <add>, %251, %cst_121 [0] : vector<32x128xf32> to vector<128xf32>
    %253 = vector.shape_cast %252 : vector<128xf32> to vector<1x128xf32>
    %cst_122 = arith.constant 0.001953125 : f32
    %254 = vector.broadcast %cst_122 : f32 to vector<1x128xf32>
    %255 = arith.mulf %253, %254 : vector<1x128xf32>
    %256 = vector.broadcast %255 : vector<1x128xf32> to vector<32x128xf32>
    %257 = arith.subf %249, %256 : vector<32x128xf32>
    %258 = arith.mulf %257, %257 : vector<32x128xf32>
    %cst_123 = arith.constant dense<0.000000e+00> : vector<32x128xf32>
    %259 = tpu.matmul %258, %250, %cst_123 {dimension_numbers = #tpu.dot_dimension_numbers<[1], [0], [0], [1], [0, 0, 1, 1], [], []>} : vector<32x128xf32>, vector<128x128xf32>, vector<32x128xf32> -> vector<32x128xf32>
    %cst_124 = arith.constant dense<0.000000e+00> : vector<128xf32>
    %260 = vector.multi_reduction <add>, %259, %cst_124 [0] : vector<32x128xf32> to vector<128xf32>
    %261 = vector.shape_cast %260 : vector<128xf32> to vector<1x128xf32>
    %cst_125 = arith.constant 0.001953125 : f32
    %262 = vector.broadcast %cst_125 : f32 to vector<1x128xf32>
    %263 = arith.mulf %261, %262 : vector<1x128xf32>
    %cst_126 = arith.constant 9.99999974E-6 : f32
    %264 = vector.broadcast %cst_126 : f32 to vector<1x128xf32>
    %265 = arith.addf %263, %264 : vector<1x128xf32>
    %266 = math.rsqrt %265 : vector<1x128xf32>
    %c0_127 = arith.constant 0 : index
    %c0_128 = arith.constant 0 : index
    %267 = vector.load %arg7[%c0_127, %c0_128] : memref<1x128xf32, #tpu.memory_space<vmem>>, vector<1x128xf32>
    %268 = arith.mulf %266, %267 : vector<1x128xf32>
    %269 = vector.broadcast %268 : vector<1x128xf32> to vector<32x128xf32>
    %270 = arith.mulf %257, %269 : vector<32x128xf32>
    %c0_129 = arith.constant 0 : index
    %c0_130 = arith.constant 0 : index
    %271 = vector.load %arg8[%c0_129, %c0_130] : memref<1x128xf32, #tpu.memory_space<vmem>>, vector<1x128xf32>
    %272 = vector.broadcast %271 : vector<1x128xf32> to vector<32x128xf32>
    %273 = arith.addf %270, %272 : vector<32x128xf32>
    %cst_131 = arith.constant 0.000000e+00 : f32
    %274 = vector.broadcast %cst_131 : f32 to vector<32x128xf32>
    %275 = arith.maximumf %273, %274 : vector<32x128xf32>
    %c0_132 = arith.constant 0 : index
    %c0_133 = arith.constant 0 : index
    %276 = vector.load %arg9[%c0_132, %c0_133] : memref<32x128xf32, #tpu.memory_space<vmem>>, vector<32x128xf32>
    tpu.vector_store %arg9[%c0_132, %c0_133], %275 {strides = array<i32>} : memref<32x128xf32, #tpu.memory_space<vmem>>, vector<32x128xf32>,
    return
  }
  func.func @transform_0(%arg0: i32) -> (i32, i32) {
    %c0_i32 = arith.constant 0 : i32
    %c0_i32_0 = arith.constant 0 : i32
    %c0_i32_1 = arith.constant 0 : i32
    return %c0_i32, %c0_i32_0 : i32, i32
  }
  func.func @transform_1(%arg0: i32) -> (i32, i32) {
    %c0_i32 = arith.constant 0 : i32
    %c0_i32_0 = arith.constant 0 : i32
    %c0_i32_1 = arith.constant 0 : i32
    return %c0_i32, %c0_i32_0 : i32, i32
  }
  func.func @transform_2(%arg0: i32) -> (i32, i32) {
    %c0_i32 = arith.constant 0 : i32
    %c0_i32_0 = arith.constant 0 : i32
    %c0_i32_1 = arith.constant 0 : i32
    return %c0_i32, %c0_i32_0 : i32, i32
  }
  func.func @transform_3(%arg0: i32) -> (i32, i32) {
    %c0_i32 = arith.constant 0 : i32
    %c0_i32_0 = arith.constant 0 : i32
    %c0_i32_1 = arith.constant 0 : i32
    return %c0_i32, %c0_i32_0 : i32, i32
  }
  func.func @transform_4(%arg0: i32) -> (i32, i32) {
    %c0_i32 = arith.constant 0 : i32
    %c0_i32_0 = arith.constant 0 : i32
    %c0_i32_1 = arith.constant 0 : i32
    return %c0_i32, %c0_i32_0 : i32, i32
  }
  func.func @transform_5(%arg0: i32) -> (i32, i32) {
    %c0_i32 = arith.constant 0 : i32
    %c0_i32_0 = arith.constant 0 : i32
    %c0_i32_1 = arith.constant 0 : i32
    return %c0_i32, %c0_i32_0 : i32, i32
  }
  func.func @transform_6(%arg0: i32) -> (i32, i32) {
    %c0_i32 = arith.constant 0 : i32
    %c0_i32_0 = arith.constant 0 : i32
    %c0_i32_1 = arith.constant 0 : i32
    return %c0_i32, %c0_i32_0 : i32, i32
  }
  func.func @transform_7(%arg0: i32) -> (i32, i32) {
    %c0_i32 = arith.constant 0 : i32
    %c0_i32_0 = arith.constant 0 : i32
    %c0_i32_1 = arith.constant 0 : i32
    return %c0_i32, %c0_i32_0 : i32, i32
  }
  func.func @transform_8(%arg0: i32) -> (i32, i32) {
    %c0_i32 = arith.constant 0 : i32
    %c0_i32_0 = arith.constant 0 : i32
    %c0_i32_1 = arith.constant 0 : i32
    return %c0_i32, %c0_i32_0 : i32, i32
  }
}

</mosaic_0001>

<bundles_post_ra>
// kernel: tpu_custom_call.1
= control target key start
LH: loop header
LB: loop body
LE: loop exit
PB: predicated region body
PF: predicated region fallthrough
CT: control target
= control target key end

     0   :  { %13 = vsyncpa [#allocation3], 0  ;;  %s2305_s0 = inlined_call_operand.hbm [shape: f32[32,128], index: 0, kind: input, shape index: {}]   ;;  %s2306_s1 = inlined_call_operand.hbm [shape: f32[1152,128], index: 1, kind: input, shape index: {}]   ;;  %s2307_s2 = inlined_call_operand.hbm [shape: f32[1152,128], index: 2, kind: input, shape index: {}]   ;;  %s2308_s3 = inlined_call_operand.hbm [shape: f32[128,128], index: 3, kind: input, shape index: {}]   ;;  %s2309_s4 = inlined_call_operand.vmem [shape: f32[1,128], index: 4, kind: input, shape index: {}]   ;;  %s2310_s5 = inlined_call_operand.vmem [shape: f32[1,128], index: 5, kind: input, shape index: {}]   ;;  %s2311_s6 = inlined_call_operand.vmem [shape: f32[1,128], index: 6, kind: input, shape index: {}]   ;;  %s2312_s7 = inlined_call_operand.vmem [shape: f32[1,128], index: 7, kind: input, shape index: {}]   ;;  %s2313_s8 = inlined_call_operand.hbm [shape: f32[32,128], index: 8, kind: output, shape index: {}]  }
   0x1   :  { %14 = vsyncpa [#allocation6], 0 }
   0x2   :  { %15 = vsyncpa [#allocation9], 0 }
   0x3   :  { %16 = vsyncpa [#allocation4], 0  ;;  %s34_s29 = sshll.u32 %s2306_s1, 4  ;;  %s1769_s30 = smov [#allocation5]   ;;  %s35_s29 = int_to_ptr.hbm [resolvable:$true] %s34_s29 }
   0x4   :  { %s36_s9 = sshll.u32 %s1769_s30, 4  ;;  %s21_s12 = sshll.u32 %s2305_s0, 4  ;;  %s37_s9 = int_to_ptr.vmem [resolvable:$true] %s36_s9  ;;  %s22_s12 = int_to_ptr.hbm [resolvable:$true] %s21_s12 }
   0x5   :  { %s1770_s13 = smov 128   ;;  %s1771_s14 = smov 8  }
   0x6   :  { %42 = dma.hbm_to_vmem [thread:$0]  %s35_s29, 18432, %s37_s9, [#allocation6], %s1770_s13, %s1770_s13, %s1771_s14  }
   0x7   :  { %s1772_s15 = smov [#allocation2]   ;;  %s47_s1 = sshll.u32 %s2307_s2, 4  ;;  %s48_s1 = int_to_ptr.hbm [resolvable:$true] %s47_s1 }
   0x8   :  { %s23_s16 = sshll.u32 %s1772_s15, 4  ;;  %s60_s20 = sshll.u32 %s2308_s3, 4  ;;  %s24_s16 = int_to_ptr.vmem [resolvable:$true] %s23_s16  ;;  %s61_s20 = int_to_ptr.hbm [resolvable:$true] %s60_s20 }
   0x9   :  { %29 = dma.hbm_to_vmem [thread:$0]  %s22_s12, 512, %s24_s16, [#allocation3], %s1770_s13, %s1770_s13, %s1771_s14  }
   0xa   :  { %s1773_s21 = smov [#allocation7]   ;;  %s1774_s23 = smov [#allocation8]  }
   0xb   :  { %s49_s22 = sshll.u32 %s1773_s21, 4  ;;  %s62_s2 = sshll.u32 %s1774_s23, 4  ;;  %s50_s22 = int_to_ptr.vmem [resolvable:$true] %s49_s22  ;;  %s63_s2 = int_to_ptr.vmem [resolvable:$true] %s62_s2 }
   0xc   :  { %55 = dma.hbm_to_vmem [thread:$0]  %s48_s1, 18432, %s50_s22, [#allocation6], %s1770_s13, %s1770_s13, %s1771_s14  }
   0xd   :  { %68 = dma.hbm_to_vmem [thread:$0]  %s61_s20, 2048, %s63_s2, [#allocation9], %s1770_s13, %s1770_s13, %s1771_s14  }
   0xe   :  { %1761 = dma.done.wait [#allocation3], 512  }
   0xf   :  { %1762 = vsyncadd [#allocation3], 4294966784 }
  0x10   :  { %1763 = dma.done.wait [#allocation6], 36864  }
  0x11   :  { %1764 = vsyncadd [#allocation6], 4294930432 }
  0x12   :  { %1765 = dma.done.wait [#allocation9], 2048  }
  0x13   :  { %1766 = vsyncadd [#allocation9], 4294965248  ;;  %v93_v0 = vlaneseq  ;;  %v1852_v3 = vld [vmem:[#allocation2] sm:$0xff]  ;;  %v1854_v4 = vld [vmem:[#allocation2 + $0x18] sm:$0xff]  ;;  %s1775_s3 = smov 4   ;;  %s1776_s24 = smov 124  }
  0x14   :  { %v1857_v5 = vld [vmem:[#allocation2 + $0x8] sm:$0xff]  ;;  %v162_v7 = vrot.slane %v1852_v3, 7  ;;  %v165_v8 = vrot.slane %v1854_v4, 7  ;;  %v1878_v13 = vld [vmem:[#allocation2 + $0x10] sm:$0xff]  ;;  %v228_v27 = vld [vmem:[#allocation5 + $0xf8] sm:$0xff]  ;;  %v521_v29 = vrot.slane %v1852_v3, 1 }
  0x15   :  { %v1849_v1 = vshrl.u32 %v93_v0, 7  ;;  %352 = vrot.lane.b32.xlu2 %v1857_v5, %s1775_s3  ;;  %v163_v11 = vrot.slane %v1857_v5, 7  ;;  %v164_v16 = vrot.slane %v1878_v13, 7  ;;  %v523_v23 = vrot.slane %v1878_v13, 1  ;;  %v227_v28 = vld [vmem:[#allocation5 + $0xf0] sm:$0xff]  ;;  %229 = vmatpush.msra.mxu0 %v228_v27  ;;  %v226_v30 = vld [vmem:[#allocation5 + $0xe8] sm:$0xff] }
  0x16   :  { %v522_v24 = vrot.slane %v1857_v5, 1  ;;  %v212_v32 = vld [vmem:[#allocation5 + $0x78] sm:$0xff]  ;;  %v225_v34 = vld [vmem:[#allocation5 + $0xe0] sm:$0xff]  ;;  %v211_v35 = vld [vmem:[#allocation5 + $0x70] sm:$0xff]  ;;  %v524_v41 = vrot.slane %v1854_v4, 1  ;;  %s1506_s15 = sshll.u32 %s2313_s8, 4  ;;  %s1507_s15 = int_to_ptr.hbm [resolvable:$true] %s1506_s15 }
  0x17   :  { %v102_v2 = vand.u32 15, %v1849_v1  ;;  %vm166_vm0 = vcmp.lt.s32.totalorder %v1849_v1, 1  ;;  %v96_v12 = vadd.s32 16, %v1849_v1  ;;  %v95_v20 = vadd.s32 8, %v1849_v1  ;;  %230 = vmatpush.msra.mxu0 %v227_v28  ;;  %v316_v33 = vld [vmem:[#allocation5 + $0x178] sm:$0xff]  ;;  %258 = vmatpush.msra.mxu1 %v212_v32  ;;  %v315_v36 = vld [vmem:[#allocation5 + $0x170] sm:$0xff] }
  0x18   :  { %v1869_v9 = vsel %vm166_vm0, %v165_v8, %v162_v7  ;;  %v1882_v14 = vsel %vm166_vm0, %v162_v7, %v163_v11  ;;  %v1897_v18 = vsel %vm166_vm0, %v163_v11, %v164_v16  ;;  %v1909_v21 = vsel %vm166_vm0, %v164_v16, %v165_v8  ;;  %317 = vmatpush.msra.mxu2 %v316_v33  ;;  %v224_v38 = vld [vmem:[#allocation5 + $0xd8] sm:$0xff]  ;;  %v210_v40 = vld [vmem:[#allocation5 + $0x68] sm:$0xff]  ;;  %v223_v44 = vld [vmem:[#allocation5 + $0xd0] sm:$0xff] }
  0x19   :  { %vm1859_vm1 = vcmp.ne.s32.totalorder %v102_v2, 0  ;;  %v116_v15 = vand.u32 15, %v96_v12  ;;  %v109_v22 = vand.u32 15, %v95_v20  ;;  %vm525_vm3 = vcmp.lt.s32.totalorder %v1849_v1, 7  ;;  %231 = vmatpush.msra.mxu0 %v226_v30  ;;  %259 = vmatpush.msra.mxu1 %v211_v35  ;;  %v314_v42 = vld [vmem:[#allocation5 + $0x168] sm:$0xff]  ;;  %v377_v43 = vld [vmem:[#allocation5 + $0x1f8] sm:$0xff] }
  0x1a   :  { %v179_v10 = vsel %vm1859_vm1, %v1869_v9, 0.0  ;;  %v1926_v26 = vsel %vm525_vm3, %v522_v24, %v523_v23  ;;  %v1938_v37 = vsel %vm525_vm3, %v521_v29, %v522_v24  ;;  %v97_v39 = vadd.s32 24, %v1849_v1  ;;  %318 = vmatpush.msra.mxu2 %v315_v36  ;;  %v209_v45 = vld [vmem:[#allocation5 + $0x60] sm:$0xff]  ;;  %v222_v47 = vld [vmem:[#allocation5 + $0xc8] sm:$0xff]  ;;  %v208_v49 = vld [vmem:[#allocation5 + $0x58] sm:$0xff]  ;;  %378 = vmatpush.msra.mxu3 %v377_v43 }
  0x1b   :  { %183 = vrot.lane.b32.xlu1 %v179_v10, %s1775_s3  ;;  %287 = vrot.lane.b32.xlu0 %v179_v10, %s1776_s24  ;;  %vm1891_vm2 = vcmp.ne.s32.totalorder %v116_v15, 0  ;;  %vm1920_vm4 = vcmp.ne.s32.totalorder %v109_v22, 15  ;;  %v313_v46 = vld [vmem:[#allocation5 + $0x160] sm:$0xff]  ;;  %v1948_v50 = vsel %vm525_vm3, %v523_v23, %v524_v41  ;;  %v312_v51 = vld [vmem:[#allocation5 + $0x158] sm:$0xff]  ;;  %v376_v52 = vld [vmem:[#allocation5 + $0x1f0] sm:$0xff]  ;;  %v1958_v56 = vsel %vm525_vm3, %v524_v41, %v521_v29 }
  0x1c   :  { %v181_v19 = vsel %vm1891_vm2, %v1897_v18, 0.0  ;;  %v1932_v31 = vsel %vm1920_vm4, %v1926_v26, 0.0  ;;  %232 = vmatpush.msra.mxu0 %v225_v34  ;;  %260 = vmatpush.msra.mxu1 %v210_v40  ;;  %v123_v48 = vand.u32 15, %v97_v39  ;;  %v221_v53 = vld [vmem:[#allocation5 + $0xc0] sm:$0xff]  ;;  %v207_v54 = vld [vmem:[#allocation5 + $0x50] sm:$0xff]  ;;  %v220_v57 = vld [vmem:[#allocation5 + $0xb8] sm:$0xff] }
  0x1d   :  { %185 = vrot.lane.b32.xlu2 %v1882_v14, %s1775_s3  ;;  %319 = vmatpush.msra.mxu2 %v314_v42  ;;  %v311_v58 = vld [vmem:[#allocation5 + $0x150] sm:$0xff]  ;;  %v206_v59 = vld [vmem:[#allocation5 + $0x48] sm:$0xff]  ;;  %v205_v2 = vld [vmem:[#allocation5 + $0x40] sm:$0xff] }
  0x1e   :  { %233 = vmatpush.msra.mxu0 %v224_v38  ;;  %261 = vmatpush.msra.mxu1 %v209_v45  ;;  %vm1952_vm5 = vcmp.ne.s32.totalorder %v123_v48, 15  ;;  %v375_v60 = vld [vmem:[#allocation5 + $0x1e8] sm:$0xff]  ;;  %v219_v61 = vld [vmem:[#allocation5 + $0xb0] sm:$0xff]  ;;  %v309_v8 = vld [vmem:[#allocation5 + $0x140] sm:$0xff] }
  0x1f   :  { %320 = vmatpush.msra.mxu2 %v313_v46  ;;  %379 = vmatpush.msra.mxu3 %v376_v52  ;;  %v310_v62 = vld [vmem:[#allocation5 + $0x148] sm:$0xff]  ;;  %v541_v63 = vsel %vm1952_vm5, %v1958_v56, 0.0  ;;  %v374_v10 = vld [vmem:[#allocation5 + $0x1e0] sm:$0xff]  ;;  %v204_v11 = vld [vmem:[#allocation5 + $0x38] sm:$0xff] }
  0x20   :  { %234 = vmatpush.msra.mxu0 %v223_v44  ;;  %262 = vmatpush.msra.mxu1 %v208_v49  ;;  %v218_v7 = vld [vmem:[#allocation5 + $0xa8] sm:$0xff]  ;;  %v217_v12 = vld [vmem:[#allocation5 + $0xa0] sm:$0xff]  ;;  %v308_v15 = vld [vmem:[#allocation5 + $0x138] sm:$0xff] }
  0x21   :  { %321 = vmatpush.msra.mxu2 %v312_v51  ;;  %380 = vmatpush.msra.mxu3 %v375_v60  ;;  %v216_v16 = vld [vmem:[#allocation5 + $0x98] sm:$0xff]  ;;  %v203_v20 = vld [vmem:[#allocation5 + $0x30] sm:$0xff]  ;;  %v202_v27 = vld [vmem:[#allocation5 + $0x28] sm:$0xff] }
  0x22   :  { %235 = vmatpush.msra.mxu0 %v222_v47  ;;  %263 = vmatpush.msra.mxu1 %v207_v54  ;;  %v307_v22 = vld [vmem:[#allocation5 + $0x130] sm:$0xff]  ;;  %v214_v28 = vld [vmem:[#allocation5 + $0x88] sm:$0xff]  ;;  %v201_v32 = vld [vmem:[#allocation5 + $0x20] sm:$0xff] }
  0x23   :  { %350 = vrot.lane.b32.xlu0 %v1852_v3, %s1775_s3  ;;  %289 = vrot.lane.b32.xlu1 %v1882_v14, %s1776_s24  ;;  %v215_v23 = vld [vmem:[#allocation5 + $0x90] sm:$0xff]  ;;  %v306_v29 = vld [vmem:[#allocation5 + $0x128] sm:$0xff]  ;;  %v213_v33 = vld [vmem:[#allocation5 + $0x80] sm:$0xff] }
  0x24   :  { %236 = vmatpush.msra.mxu0 %v221_v53  ;;  %322 = vmatpush.msra.mxu2 %v311_v58  ;;  %v372_v24 = vld [vmem:[#allocation5 + $0x1d0] sm:$0xff]  ;;  %v371_v30 = vld [vmem:[#allocation5 + $0x1c8] sm:$0xff]  ;;  %v305_v34 = vld [vmem:[#allocation5 + $0x120] sm:$0xff] }
  0x25   :  { %187 = vrot.lane.b32.xlu2 %v181_v19, %s1775_s3  ;;  %264 = vmatpush.msra.mxu1 %v206_v59  ;;  %v426_v35 = vld [vmem:[#allocation5 + $0x278] sm:$0xff]  ;;  %v425_v40 = vld [vmem:[#allocation5 + $0x270] sm:$0xff]  ;;  %v424_v44 = vld [vmem:[#allocation5 + $0x268] sm:$0xff] }
  0x26   :  { %237 = vmatpush.msra.mxu0 %v220_v57  ;;  %323 = vmatpush.msra.mxu2 %v310_v62  ;;  %v200_v36 = vld [vmem:[#allocation5 + $0x18] sm:$0xff]  ;;  %v199_v41 = vld [vmem:[#allocation5 + $0x10] sm:$0xff]  ;;  %v198_v45 = vld [vmem:[#allocation5 + $0x8] sm:$0xff] }
  0x27   :  { %265 = vmatpush.msra.mxu1 %v205_v2  ;;  %381 = vmatpush.msra.mxu3 %v374_v10  ;;  %v304_v38 = vld [vmem:[#allocation5 + $0x118] sm:$0xff]  ;;  %v303_v42 = vld [vmem:[#allocation5 + $0x110] sm:$0xff]  ;;  %v302_v46 = vld [vmem:[#allocation5 + $0x108] sm:$0xff] }
  0x28   :  { %238 = vmatpush.msra.mxu0 %v219_v61  ;;  %324 = vmatpush.msra.mxu2 %v309_v8  ;;  %v369_v39 = vld [vmem:[#allocation5 + $0x1b8] sm:$0xff]  ;;  %v368_v43 = vld [vmem:[#allocation5 + $0x1b0] sm:$0xff]  ;;  %v367_v47 = vld [vmem:[#allocation5 + $0x1a8] sm:$0xff] }
  0x29   :  { %266 = vmatpush.msra.mxu1 %v204_v11  ;;  %v423_v48 = vld [vmem:[#allocation5 + $0x260] sm:$0xff]  ;;  %v422_v51 = vld [vmem:[#allocation5 + $0x258] sm:$0xff]  ;;  %v421_v53 = vld [vmem:[#allocation5 + $0x250] sm:$0xff] }
  0x2a   :  { %239 = vmatpush.msra.mxu0 %v218_v7  ;;  %325 = vmatpush.msra.mxu2 %v308_v15  ;;  %v197_v49 = vld [vmem:[#allocation5] sm:$0xff]  ;;  %v420_v54 = vld [vmem:[#allocation5 + $0x248] sm:$0xff]  ;;  %v418_v58 = vld [vmem:[#allocation5 + $0x238] sm:$0xff] }
  0x2b   :  { %291 = vrot.lane.b32.xlu0 %v181_v19, %s1776_s24  ;;  %354 = vrot.lane.b32.xlu1 %v1878_v13, %s1775_s3  ;;  %v373_v19 = vld [vmem:[#allocation5 + $0x1d8] sm:$0xff]  ;;  %v366_v52 = vld [vmem:[#allocation5 + $0x1a0] sm:$0xff]  ;;  %v417_v61 = vld [vmem:[#allocation5 + $0x230] sm:$0xff] }
  0x2c   :  { %240 = vmatpush.msra.mxu0 %v217_v12  ;;  %382 = vmatpush.msra.mxu3 %v373_v19  ;;  %v419_v57 = vld [vmem:[#allocation5 + $0x240] sm:$0xff]  ;;  %v365_v59 = vld [vmem:[#allocation5 + $0x198] sm:$0xff]  ;;  %v364_v62 = vld [vmem:[#allocation5 + $0x190] sm:$0xff] }
  0x2d   :  { %189 = vrot.lane.b32.xlu2 %v1909_v21, %s1775_s3  ;;  %267 = vmatpush.msra.mxu1 %v203_v20  ;;  %v487_v60 = vld [vmem:[#allocation5 + $0x2f8] sm:$0xff]  ;;  %v568_v2 = vld [vmem:[#allocation5 + $0x370] sm:$0xff]  ;;  %v416_v7 = vld [vmem:[#allocation5 + $0x228] sm:$0xff] }
  0x2e   :  { %241 = vmatpush.msra.mxu0 %v216_v16  ;;  %326 = vmatpush.msra.mxu2 %v307_v22  ;;  %v363_v8 = vld [vmem:[#allocation5 + $0x188] sm:$0xff]  ;;  %v362_v11 = vld [vmem:[#allocation5 + $0x180] sm:$0xff]  ;;  %v414_v16 = vld [vmem:[#allocation5 + $0x218] sm:$0xff] }
  0x2f   :  { %383 = vmatpush.msra.mxu3 %v372_v24  ;;  %268 = vmatpush.msra.mxu1 %v202_v27  ;;  %v485_v10 = vld [vmem:[#allocation5 + $0x2e8] sm:$0xff]  ;;  %v484_v12 = vld [vmem:[#allocation5 + $0x2e0] sm:$0xff]  ;;  %v618_v19 = vld [vmem:[#allocation5 + $0x3f8] sm:$0xff] }
  0x30   :  { %242 = vmatpush.msra.mxu0 %v215_v23  ;;  %327 = vmatpush.msra.mxu2 %v306_v29  ;;  %v566_v15 = vld [vmem:[#allocation5 + $0x360] sm:$0xff]  ;;  %v483_v20 = vld [vmem:[#allocation5 + $0x2d8] sm:$0xff]  ;;  %v413_v23 = vld [vmem:[#allocation5 + $0x210] sm:$0xff] }
  0x31   :  { %384 = vmatpush.msra.mxu3 %v371_v30  ;;  %269 = vmatpush.msra.mxu1 %v201_v32  ;;  %v565_v22 = vld [vmem:[#allocation5 + $0x358] sm:$0xff]  ;;  %v617_v24 = vld [vmem:[#allocation5 + $0x3f0] sm:$0xff]  ;;  %v412_v29 = vld [vmem:[#allocation5 + $0x208] sm:$0xff] }
  0x32   :  { %243 = vmatpush.msra.mxu0 %v214_v28  ;;  %328 = vmatpush.msra.mxu2 %v305_v34  ;;  %v482_v27 = vld [vmem:[#allocation5 + $0x2d0] sm:$0xff]  ;;  %v616_v30 = vld [vmem:[#allocation5 + $0x3e8] sm:$0xff]  ;;  %v411_v34 = vld [vmem:[#allocation5 + $0x200] sm:$0xff] }
  0x33   :  { %293 = vrot.lane.b32.xlu0 %v1909_v21, %s1776_s24  ;;  %356 = vrot.lane.b32.xlu1 %v1854_v4, %s1775_s3  ;;  %v564_v28 = vld [vmem:[#allocation5 + $0x350] sm:$0xff]  ;;  %v481_v32 = vld [vmem:[#allocation5 + $0x2c8] sm:$0xff] }
  0x34   :  { %244 = vmatpush.msra.mxu0 %v213_v33  ;;  %270 = vmatpush.msra.mxu1 %v200_v36  ;;  %v563_v33 = vld [vmem:[#allocation5 + $0x348] sm:$0xff]  ;;  %v562_v36 = vld [vmem:[#allocation5 + $0x340] sm:$0xff]  ;;  %v883_v1 = vld [vmem:[#allocation7 + $0x50] sm:$0xff] }
  0x35   :  { %544 = vrot.lane.b32.xlu2 %v1932_v31, %s1775_s3  ;;  %1521 = vmatmul.msk.f32.vlgmr.msra.gmra.mxu0 %vm1859_vm1, %v1869_v9  ;;  %v301_v9 = vld [vmem:[#allocation5 + $0x100] sm:$0xff]  ;;  %v990_v17 = vld [vmem:[#allocation7 + $0x168] sm:$0xff] }
  0x36   :  { %427 = vmatpush.msrb.mxu0 %v426_v35  ;;  %329 = vmatpush.msra.mxu2 %v304_v38  ;;  %v480_v35 = vld [vmem:[#allocation5 + $0x2c0] sm:$0xff]  ;;  %v614_v38 = vld [vmem:[#allocation5 + $0x3d8] sm:$0xff] }
  0x37   :  { %271 = vmatpush.msra.mxu1 %v199_v41  ;;  %v561_v41 = vld [vmem:[#allocation5 + $0x338] sm:$0xff] }
  0x38   :  { %428 = vmatpush.msrb.mxu0 %v425_v40  ;;  %330 = vmatpush.msra.mxu2 %v303_v42  ;;  %v479_v40 = vld [vmem:[#allocation5 + $0x2b8] sm:$0xff]  ;;  %v613_v42 = vld [vmem:[#allocation5 + $0x3d0] sm:$0xff] }
  0x39   :  { %272 = vmatpush.msra.mxu1 %v198_v45  ;;  %v560_v45 = vld [vmem:[#allocation5 + $0x330] sm:$0xff] }
  0x3a   :  { %429 = vmatpush.msrb.mxu0 %v424_v44  ;;  %331 = vmatpush.msra.mxu2 %v302_v46  ;;  %v478_v44 = vld [vmem:[#allocation5 + $0x2b0] sm:$0xff]  ;;  %v612_v46 = vld [vmem:[#allocation5 + $0x3c8] sm:$0xff] }
  0x3b   :  { %542 = vrot.lane.b32.xlu0 %v1938_v37, %s1775_s3  ;;  %460 = vrot.lane.b32.xlu1 %v1852_v3, %s1776_s24 }
  0x3c   :  { %430 = vmatpush.msrb.mxu0 %v423_v48  ;;  %273 = vmatpush.msra.mxu1 %v197_v49  ;;  %v477_v48 = vld [vmem:[#allocation5 + $0x2a8] sm:$0xff] }
  0x3d   :  { %546 = vrot.lane.b32.xlu2 %v1948_v50, %s1775_s3  ;;  %248 = vmatmul.f32.gmra.mxu0 %v1882_v14  ;;  %v569_v14 = vld [vmem:[#allocation5 + $0x378] sm:$0xff]  ;;  %v559_v49 = vld [vmem:[#allocation5 + $0x328] sm:$0xff] }
  0x3e   :  { %332 = vmatpush.msra.mxu2 %v301_v9  ;;  %431 = vmatpush.msrb.mxu0 %v422_v51  ;;  %v611_v9 = vld [vmem:[#allocation5 + $0x3c0] sm:$0xff] }
  0x3f   :  { %488 = vmatpush.msrb.mxu1 %v487_v60  ;;  %v476_v51 = vld [vmem:[#allocation5 + $0x2a0] sm:$0xff]  ;;  %v557_v60 = vld [vmem:[#allocation5 + $0x318] sm:$0xff] }
  0x40   :  { %432 = vmatpush.msrb.mxu0 %v421_v53  ;;  %570 = vmatpush.msrb.mxu2 %v569_v14  ;;  %v558_v53 = vld [vmem:[#allocation5 + $0x320] sm:$0xff]  ;;  %v609_v14 = vld [vmem:[#allocation5 + $0x3b0] sm:$0xff] }
  0x42   :  { %433 = vmatpush.msrb.mxu0 %v420_v54  ;;  %571 = vmatpush.msrb.mxu2 %v568_v2  ;;  %v1989_v54 = vand.u32 127, %v93_v0  ;;  %v608_v2 = vld [vmem:[#allocation5 + $0x3a8] sm:$0xff] }
  0x43   :  { %462 = vrot.lane.b32.xlu1 %v1857_v5, %s1776_s24  ;;  %652 = vrot.lane.b32.xlu0 %v1938_v37, %s1776_s24  ;;  %v673_v0 = vld [vmem:[#allocation5 + $0x448] sm:$0xff] }
  0x44   :  { %434 = vmatpush.msrb.mxu0 %v419_v57  ;;  %v610_v57 = vld [vmem:[#allocation5 + $0x3b8] sm:$0xff]  ;;  %vm160_vm6 = vcmp.ge.s32.totalorder %v1989_v54, 4  ;;  %vm161_vm7 = vcmp.lt.s32.totalorder %v1989_v54, 60  ;;  %vm846_vm11 = vcmp.lt.s32.totalorder %v1989_v54, 120  ;;  %vm845_vm12 = vcmp.ge.s32.totalorder %v1989_v54, 8 }
  0x45   :  { %548 = vrot.lane.b32.xlu2 %v541_v63, %s1775_s3  ;;  %1522 = vmatmul.msk.f32.gmra.mxu0 %vm1891_vm2, %v1897_v18  ;;  %v567_v18 = vld [vmem:[#allocation5 + $0x368] sm:$0xff] }
  0x46   :  { %435 = vmatpush.msrb.mxu0 %v418_v58  ;;  %572 = vmatpush.msrb.mxu2 %v567_v18  ;;  %v675_v58 = vld [vmem:[#allocation5 + $0x458] sm:$0xff]  ;;  %v607_v18 = vld [vmem:[#allocation5 + $0x3a0] sm:$0xff] }
  0x48   :  { %436 = vmatpush.msrb.mxu0 %v417_v61  ;;  %573 = vmatpush.msrb.mxu2 %v566_v15  ;;  %v674_v61 = vld [vmem:[#allocation5 + $0x450] sm:$0xff] }
  0x4a   :  { %437 = vmatpush.msrb.mxu0 %v416_v7  ;;  %574 = vmatpush.msrb.mxu2 %v565_v22  ;;  %v555_v7 = vld [vmem:[#allocation5 + $0x308] sm:$0xff]  ;;  %v670_v22 = vld [vmem:[#allocation5 + $0x430] sm:$0xff] }
  0x4b   :  { %464 = vrot.lane.b32.xlu1 %v1878_v13, %s1776_s24  ;;  %654 = vrot.lane.b32.xlu0 %v1932_v31, %s1776_s24  ;;  %v370_v31 = vld [vmem:[#allocation5 + $0x1c0] sm:$0xff] }
  0x4c   :  { %385 = vmatpush.msra.mxu3 %v370_v31  ;;  %575 = vmatpush.msrb.mxu2 %v564_v28  ;;  %v615_v31 = vld [vmem:[#allocation5 + $0x3e0] sm:$0xff]  ;;  %v604_v28 = vld [vmem:[#allocation5 + $0x388] sm:$0xff] }
  0x4d   :  { %658 = vrot.lane.b32.xlu2 %v541_v63, %s1776_s24  ;;  %254 = vmatmul.f32.gmra.mxu0 %v1909_v21  ;;  %v486_v63 = vld [vmem:[#allocation5 + $0x2f0] sm:$0xff]  ;;  %v415_v21 = vld [vmem:[#allocation5 + $0x220] sm:$0xff] }
  0x4e   :  { %386 = vmatpush.msra.mxu3 %v369_v39  ;;  %489 = vmatpush.msrb.mxu1 %v486_v63  ;;  %v679_v39 = vld [vmem:[#allocation5 + $0x478] sm:$0xff]  ;;  %v556_v63 = vld [vmem:[#allocation5 + $0x310] sm:$0xff] }
  0x4f   :  { %438 = vmatpush.msrb.mxu0 %v415_v21  ;;  %576 = vmatpush.msrb.mxu2 %v563_v33  ;;  %v672_v21 = vld [vmem:[#allocation5 + $0x440] sm:$0xff]  ;;  %v666_v33 = vld [vmem:[#allocation5 + $0x410] sm:$0xff] }
  0x50   :  { %387 = vmatpush.msra.mxu3 %v368_v43  ;;  %490 = vmatpush.msrb.mxu1 %v485_v10  ;;  %v678_v43 = vld [vmem:[#allocation5 + $0x470] sm:$0xff] }
  0x51   :  { %439 = vmatpush.msrb.mxu0 %v414_v16  ;;  %577 = vmatpush.msrb.mxu2 %v562_v36  ;;  %v606_v16 = vld [vmem:[#allocation5 + $0x398] sm:$0xff]  ;;  %v664_v36 = vld [vmem:[#allocation5 + $0x400] sm:$0xff] }
  0x52   :  { %388 = vmatpush.msra.mxu3 %v367_v47  ;;  %491 = vmatpush.msrb.mxu1 %v484_v12  ;;  %v677_v47 = vld [vmem:[#allocation5 + $0x468] sm:$0xff]  ;;  %v554_v12 = vld [vmem:[#allocation5 + $0x300] sm:$0xff] }
  0x53   :  { %466 = vrot.lane.b32.xlu1 %v1854_v4, %s1776_s24  ;;  %656 = vrot.lane.b32.xlu0 %v1948_v50, %s1776_s24 }
  0x54   :  { %389 = vmatpush.msra.mxu3 %v366_v52  ;;  %492 = vmatpush.msrb.mxu1 %v483_v20  ;;  %v605_v20 = vld [vmem:[#allocation5 + $0x390] sm:$0xff] }
  0x55   :  { %440 = vmatpush.msrb.mxu0 %v413_v23  ;;  %578 = vmatpush.msrb.mxu2 %v561_v41  ;;  %v669_v23 = vld [vmem:[#allocation5 + $0x428] sm:$0xff] }
  0x56   :  { %390 = vmatpush.msra.mxu3 %v365_v59  ;;  %493 = vmatpush.msrb.mxu1 %v482_v27  ;;  %v475_v59 = vld [vmem:[#allocation5 + $0x298] sm:$0xff] }
  0x57   :  { %441 = vmatpush.msrb.mxu0 %v412_v29  ;;  %579 = vmatpush.msrb.mxu2 %v560_v45  ;;  %v668_v29 = vld [vmem:[#allocation5 + $0x420] sm:$0xff] }
  0x58   :  { %391 = vmatpush.msra.mxu3 %v364_v62  ;;  %494 = vmatpush.msrb.mxu1 %v481_v32  ;;  %v474_v62 = vld [vmem:[#allocation5 + $0x290] sm:$0xff] }
  0x59   :  { %442 = vmatpush.msrb.mxu0 %v411_v34  ;;  %580 = vmatpush.msrb.mxu2 %v559_v49  ;;  %v665_v34 = vld [vmem:[#allocation5 + $0x408] sm:$0xff] }
  0x5a   :  { %392 = vmatpush.msra.mxu3 %v363_v8  ;;  %495 = vmatpush.msrb.mxu1 %v480_v35 }
  0x5b   :  { %443 = vmatmul.f32.vlgmr.msrb.gmra.mxu0 %v1852_v3  ;;  %v676_v3 = vld [vmem:[#allocation5 + $0x460] sm:$0xff]  ;;  %581 = vmatpush.msrb.mxu2 %v558_v53  ;;  %v2069_v53 = vld [vmem:[#allocation8 + $0x68] sm:$0xff] }
  0x5c   :  { %393 = vmatpush.msra.mxu3 %v362_v11  ;;  %680 = vmatpush.msra.mxu0 %v679_v39  ;;  %v472_v11 = vld [vmem:[#allocation5 + $0x280] sm:$0xff] }
  0x5d   :  { %496 = vmatpush.msrb.mxu1 %v479_v40  ;;  %582 = vmatpush.msrb.mxu2 %v557_v60 }
  0x5e   :  { %619 = vmatpush.msrb.mxu3 %v618_v19  ;;  %681 = vmatpush.msra.mxu0 %v678_v43  ;;  %v671_v19 = vld [vmem:[#allocation5 + $0x438] sm:$0xff] }
  0x5f   :  { %497 = vmatpush.msrb.mxu1 %v478_v44  ;;  %583 = vmatpush.msrb.mxu2 %v556_v63  ;;  %v720_v63 = vld [vmem:[#allocation8 + $0x38] sm:$0xff] }
  0x60   :  { %620 = vmatpush.msrb.mxu3 %v617_v24  ;;  %682 = vmatpush.msra.mxu0 %v677_v47 }
  0x61   :  { %498 = vmatpush.msrb.mxu1 %v477_v48  ;;  %584 = vmatpush.msrb.mxu2 %v555_v7  ;;  %v718_v7 = vld [vmem:[#allocation8 + $0x28] sm:$0xff] }
  0x62   :  { %621 = vmatpush.msrb.mxu3 %v616_v30  ;;  %683 = vmatpush.msra.mxu0 %v676_v3  ;;  %v667_v30 = vld [vmem:[#allocation5 + $0x418] sm:$0xff] }
  0x63   :  { %499 = vmatpush.msrb.mxu1 %v476_v51  ;;  %446 = vmatmul.f32.gmra.mxu0 %v1857_v5  ;;  %v473_v5 = vld [vmem:[#allocation5 + $0x288] sm:$0xff] }
  0x64   :  { %622 = vmatpush.msrb.mxu3 %v615_v31  ;;  %684 = vmatpush.msra.mxu0 %v675_v58  ;;  %v2075_v58 = vld [vmem:[#allocation8 + $0x58] sm:$0xff] }
  0x65   :  { %500 = vmatpush.msrb.mxu1 %v475_v59  ;;  %585 = vmatpush.msrb.mxu2 %v554_v12  ;;  %v2079_v59 = vld [vmem:[#allocation8 + $0x50] sm:$0xff] }
  0x66   :  { %623 = vmatpush.msrb.mxu3 %v614_v38  ;;  %685 = vmatpush.msra.mxu0 %v674_v61 }
  0x67   :  { %501 = vmatpush.msrb.mxu1 %v474_v62  ;;  %v2089_v62 = vld [vmem:[#allocation8 + $0x40] sm:$0xff] }
  0x68   :  { %624 = vmatpush.msrb.mxu3 %v613_v42  ;;  %686 = vmatpush.msra.mxu0 %v673_v0 }
  0x69   :  { %502 = vmatpush.msrb.mxu1 %v473_v5 }
  0x6a   :  { %625 = vmatpush.msrb.mxu3 %v612_v46  ;;  %687 = vmatpush.msra.mxu0 %v672_v21  ;;  %v715_v21 = vld [vmem:[#allocation8 + $0x10] sm:$0xff] }
  0x6b   :  { %503 = vmatpush.msrb.mxu1 %v472_v11  ;;  %449 = vmatmul.f32.gmra.mxu0 %v1878_v13  ;;  %v603_v13 = vld [vmem:[#allocation5 + $0x380] sm:$0xff] }
  0x6c   :  { %626 = vmatpush.msrb.mxu3 %v611_v9  ;;  %688 = vmatpush.msra.mxu0 %v671_v19  ;;  %v713_v19 = vld [vmem:[#allocation8] sm:$0xff] }
  0x6e   :  { %627 = vmatpush.msrb.mxu3 %v610_v57  ;;  %689 = vmatpush.msra.mxu0 %v670_v22  ;;  %v2073_v57 = vld [vmem:[#allocation8 + $0x60] sm:$0xff] }
  0x6f   :  { %v1986_v52 = vpop.permute.xlu2 %352 }
  0x70   :  { %628 = vmatpush.msrb.mxu3 %v609_v14  ;;  %690 = vmatpush.msra.mxu0 %v669_v23  ;;  %v2085_v14 = vld [vmem:[#allocation8 + $0x48] sm:$0xff] }
  0x72   :  { %629 = vmatpush.msrb.mxu3 %v608_v2  ;;  %691 = vmatpush.msra.mxu0 %v668_v29  ;;  %v719_v2 = vld [vmem:[#allocation8 + $0x30] sm:$0xff] }
  0x73   :  { %452 = vmatmul.f32.gmra.mxu0 %v1854_v4 }
  0x74   :  { %630 = vmatpush.msrb.mxu3 %v607_v18  ;;  %692 = vmatpush.msra.mxu0 %v667_v30 }
  0x76   :  { %631 = vmatpush.msrb.mxu3 %v606_v16  ;;  %693 = vmatpush.msra.mxu0 %v666_v33  ;;  %v714_v16 = vld [vmem:[#allocation8 + $0x8] sm:$0xff] }
  0x77   :  { %v186_v15 = vpop.permute.xlu2 %185 }
  0x78   :  { %632 = vmatpush.msrb.mxu3 %v605_v20  ;;  %694 = vmatpush.msra.mxu0 %v665_v34 }
  0x7a   :  { %633 = vmatpush.msrb.mxu3 %v604_v28  ;;  %695 = vmatpush.msra.mxu0 %v664_v36 }
  0x7c   :  { %634 = vmatpush.msrb.mxu3 %v603_v13 }
  0x7f   :  { %v188_v32 = vpop.permute.xlu2 %187 }
  0x87   :  { %v190_v4 = vpop.permute.xlu2 %189 }
  0x8d   :  { %v184_v8 = vpop.permute.xlu1 %183  ;;  %v288_v10 = vpop.permute.xlu0 %287 }
  0x8e   :  { %1523 = vmatmul.msk.f32.vlgmr.msra.gmra.mxu1 %vm160_vm6, %v184_v8  ;;  %1527 = vmatmul.msk.f32.vlgmr.msra.gmra.mxu2 %vm161_vm7, %v288_v10  ;;  %v717_v8 = vld [vmem:[#allocation8 + $0x20] sm:$0xff]  ;;  %v716_v10 = vld [vmem:[#allocation8 + $0x18] sm:$0xff] }
  0x8f   :  { %v545_v42 = vpop.permute.xlu2 %544 }
  0x95   :  { %v351_v24 = vpop.permute.xlu0 %350  ;;  %v290_v27 = vpop.permute.xlu1 %289 }
  0x96   :  { %1524 = vmatmul.msk.f32.gmra.mxu1 %vm160_vm6, %v186_v15  ;;  %1528 = vmatmul.msk.f32.gmra.mxu2 %vm161_vm7, %v290_v27 }
  0x97   :  { %1531 = vmatmul.msk.f32.vlgmr.msra.gmra.mxu3 %vm160_vm6, %v351_v24  ;;  %v547_v45 = vpop.permute.xlu2 %546 }
  0x9d   :  { %v292_v31 = vpop.permute.xlu0 %291  ;;  %v355_v35 = vpop.permute.xlu1 %354 }
  0x9e   :  { %1525 = vmatmul.msk.f32.gmra.mxu1 %vm160_vm6, %v188_v32  ;;  %1529 = vmatmul.msk.f32.gmra.mxu2 %vm161_vm7, %v292_v31 }
  0x9f   :  { %1532 = vmatmul.msk.f32.gmra.mxu3 %vm160_vm6, %v1986_v52  ;;  %v2059_v52 = vld [vmem:[#allocation8 + $0x78] sm:$0xff] }
  0xa0   :  { %729 = vmatpush.msra.mxu1 %v2059_v52  ;;  %776 = vmatpush.msra.mxu2 %v2059_v52 }
  0xa5   :  { %v294_v38 = vpop.permute.xlu0 %293  ;;  %v357_v39 = vpop.permute.xlu1 %356 }
  0xa6   :  { %1526 = vmatmul.msk.f32.gmra.mxu1 %vm160_vm6, %v190_v4  ;;  %1530 = vmatmul.msk.f32.gmra.mxu2 %vm161_vm7, %v294_v38 }
  0xa7   :  { %1533 = vmatmul.msk.f32.gmra.mxu3 %vm160_vm6, %v355_v35 }
  0xad   :  { %v543_v40 = vpop.permute.xlu0 %542  ;;  %v461_v41 = vpop.permute.xlu1 %460 }
  0xae   :  { %1535 = vmatmul.msk.f32.vlgmr.msrb.gmra.mxu1 %vm161_vm7, %v461_v41  ;;  %1539 = vmatmul.msk.f32.vlgmr.msrb.gmra.mxu2 %vm160_vm6, %v543_v40 }
  0xaf   :  { %1534 = vmatmul.msk.f32.gmra.mxu3 %vm160_vm6, %v357_v39 }
  0xb5   :  { %v463_v43 = vpop.permute.xlu1 %462  ;;  %v653_v44 = vpop.permute.xlu0 %652 }
  0xb6   :  { %1536 = vmatmul.msk.f32.gmra.mxu1 %vm161_vm7, %v463_v43  ;;  %1540 = vmatmul.msk.f32.gmra.mxu2 %vm160_vm6, %v545_v42 }
  0xb7   :  { %635 = vmatmul.f32.vlgmr.msrb.gmra.mxu3 %v1938_v37  ;;  %1545 = vmatmul.msk.f32.vlgmr.msra.gmra.mxu0 %vm161_vm7, %v653_v44  ;;  %v549_v37 = vpop.permute.xlu2 %548 }
  0xbd   :  { %v465_v46 = vpop.permute.xlu1 %464  ;;  %v655_v47 = vpop.permute.xlu0 %654 }
  0xbe   :  { %1537 = vmatmul.msk.f32.gmra.mxu1 %vm161_vm7, %v465_v46  ;;  %1541 = vmatmul.msk.f32.gmra.mxu2 %vm160_vm6, %v547_v45 }
  0xbf   :  { %1543 = vmatmul.msk.f32.gmra.mxu3 %vm1920_vm4, %v1926_v26  ;;  %1546 = vmatmul.msk.f32.gmra.mxu0 %vm161_vm7, %v655_v47  ;;  %v659_v9 = vpop.permute.xlu2 %658  ;;  %v2053_v26 = vpop.f32.mrf.mxu0 }
  0xc5   :  { %v467_v48 = vpop.permute.xlu1 %466  ;;  %v657_v49 = vpop.permute.xlu0 %656 }
  0xc6   :  { %1538 = vmatmul.msk.f32.gmra.mxu1 %vm161_vm7, %v467_v48  ;;  %1542 = vmatmul.msk.f32.gmra.mxu2 %vm160_vm6, %v549_v37 }
  0xc7   :  { %641 = vmatmul.f32.gmra.mxu3 %v1948_v50  ;;  %1547 = vmatmul.msk.f32.gmra.mxu0 %vm161_vm7, %v657_v49  ;;  %v2055_v3 = vpop.f32.mrf.mxu0  ;;  %v2061_v50 = vld [vmem:[#allocation8 + $0x70] sm:$0xff] }
  0xc8   :  { %730 = vmatpush.msra.mxu1 %v2061_v50  ;;  %777 = vmatpush.msra.mxu2 %v2061_v50 }
  0xca   :  { %731 = vmatpush.msra.mxu1 %v2069_v53  ;;  %778 = vmatpush.msra.mxu2 %v2069_v53 }
  0xcc   :  { %732 = vmatpush.msra.mxu1 %v2073_v57  ;;  %779 = vmatpush.msra.mxu2 %v2073_v57 }
  0xce   :  { %733 = vmatpush.msra.mxu1 %v2075_v58  ;;  %780 = vmatpush.msra.mxu2 %v2075_v58 }
  0xcf   :  { %1544 = vmatmul.msk.f32.gmra.mxu3 %vm1952_vm5, %v1958_v56  ;;  %1548 = vmatmul.msk.f32.gmra.mxu0 %vm161_vm7, %v659_v9  ;;  %v2057_v51 = vpop.f32.mrf.mxu0 }
  0xd0   :  { %734 = vmatpush.msra.mxu1 %v2079_v59  ;;  %781 = vmatpush.msra.mxu2 %v2079_v59 }
  0xd2   :  { %735 = vmatpush.msra.mxu1 %v2085_v14  ;;  %782 = vmatpush.msra.mxu2 %v2085_v14 }
  0xd4   :  { %736 = vmatpush.msra.mxu1 %v2089_v62  ;;  %783 = vmatpush.msra.mxu2 %v2089_v62 }
  0xd6   :  { %737 = vmatpush.msra.mxu1 %v720_v63  ;;  %784 = vmatpush.msra.mxu2 %v720_v63 }
  0xd7   :  { %v2067_v56 = vpop.f32.mrf.mxu0 }
  0xd8   :  { %738 = vmatpush.msra.mxu1 %v719_v2  ;;  %785 = vmatpush.msra.mxu2 %v719_v2 }
  0xda   :  { %739 = vmatpush.msra.mxu1 %v718_v7  ;;  %786 = vmatpush.msra.mxu2 %v718_v7 }
  0xdc   :  { %740 = vmatpush.msra.mxu1 %v717_v8  ;;  %787 = vmatpush.msra.mxu2 %v717_v8 }
  0xde   :  { %741 = vmatpush.msra.mxu1 %v716_v10  ;;  %788 = vmatpush.msra.mxu2 %v716_v10 }
  0xdf   :  { %v444_v61 = vpop.f32.mrf.mxu0 }
  0xe0   :  { %742 = vmatpush.msra.mxu1 %v715_v21  ;;  %789 = vmatpush.msra.mxu2 %v715_v21 }
  0xe2   :  { %743 = vmatpush.msra.mxu1 %v714_v16  ;;  %790 = vmatpush.msra.mxu2 %v714_v16 }
  0xe4   :  { %744 = vmatpush.msra.mxu1 %v713_v19  ;;  %791 = vmatpush.msra.mxu2 %v713_v19 }
  0xe7   :  { %v447_v18 = vpop.f32.mrf.mxu0 }
  0xef   :  { %v450_v20 = vpop.f32.mrf.mxu0 }
  0xf7   :  { %v453_v29 = vpop.f32.mrf.mxu0 }
 0x10b   :  { %v275_v60 = vpop.f32.mrf.mxu1 }
 0x10c   :  { %v276_v13 = vadd.f32 %v275_v60, %v2053_v26 }
 0x111   :  { %v334_v0 = vpop.f32.mrf.mxu2 }
 0x112   :  { %v346_v32 = vadd.f32 %v334_v0, %v276_v13 }
 0x113   :  { %v278_v5 = vpop.f32.mrf.mxu1 }
 0x114   :  { %v279_v36 = vadd.f32 %v278_v5, %v2055_v3 }
 0x119   :  { %v337_v11 = vpop.f32.mrf.mxu2 }
 0x11a   :  { %v395_v12 = vpop.f32.mrf.mxu3  ;;  %v347_v38 = vadd.f32 %v337_v11, %v279_v36 }
 0x11b   :  { %v281_v15 = vpop.f32.mrf.mxu1  ;;  %v407_v33 = vadd.f32 %v395_v12, %v346_v32 }
 0x11c   :  { %v282_v46 = vadd.f32 %v281_v15, %v2057_v51 }
 0x11d   :  { %v456_v4 = vadd.f32 %v444_v61, %v407_v33 }
 0x121   :  { %v340_v22 = vpop.f32.mrf.mxu2 }
 0x122   :  { %v398_v23 = vpop.f32.mrf.mxu3  ;;  %v348_v49 = vadd.f32 %v340_v22, %v282_v46 }
 0x123   :  { %v284_v24 = vpop.f32.mrf.mxu1  ;;  %v408_v41 = vadd.f32 %v398_v23, %v347_v38 }
 0x124   :  { %v285_v0 = vadd.f32 %v284_v24, %v2067_v56 }
 0x125   :  { %v457_v47 = vadd.f32 %v447_v18, %v408_v41 }
 0x129   :  { %v343_v27 = vpop.f32.mrf.mxu2 }
 0x12a   :  { %v401_v28 = vpop.f32.mrf.mxu3  ;;  %v349_v8 = vadd.f32 %v343_v27, %v285_v0  ;;  %v899_v0 = vld [vmem:[#allocation7 + $0xd0] sm:$0xff] }
 0x12b   :  { %v505_v30 = vpop.f32.mrf.mxu1  ;;  %v409_v26 = vadd.f32 %v401_v28, %v348_v49 }
 0x12c   :  { %v517_v39 = vadd.f32 %v505_v30, %v456_v4 }
 0x12d   :  { %v458_v5 = vadd.f32 %v450_v20, %v409_v26  ;;  %v904_v26 = vld [vmem:[#allocation7 + $0xf8] sm:$0xff] }
 0x12e   :  { %905 = vmatpush.msra.mxu3 %v904_v26 }
 0x131   :  { %v587_v34 = vpop.f32.mrf.mxu2 }
 0x132   :  { %v404_v31 = vpop.f32.mrf.mxu3  ;;  %v599_v42 = vadd.f32 %v587_v34, %v517_v39 }
 0x133   :  { %v508_v40 = vpop.f32.mrf.mxu1  ;;  %v410_v18 = vadd.f32 %v404_v31, %v349_v8 }
 0x134   :  { %v697_v35 = vpop.f32.mrf.mxu0  ;;  %v518_v9 = vadd.f32 %v508_v40, %v457_v47 }
 0x135   :  { %v459_v16 = vadd.f32 %v453_v29, %v410_v18 }
 0x139   :  { %v590_v43 = vpop.f32.mrf.mxu2 }
 0x13a   :  { %v636_v44 = vpop.f32.mrf.mxu3  ;;  %v600_v60 = vadd.f32 %v590_v43, %v518_v9 }
 0x13b   :  { %v648_v45 = vadd.f32 %v636_v44, %v599_v42  ;;  %v511_v3 = vpop.f32.mrf.mxu1 }
 0x13c   :  { %v700_v48 = vpop.f32.mrf.mxu0  ;;  %v519_v10 = vadd.f32 %v511_v3, %v458_v5  ;;  %v902_v3 = vld [vmem:[#allocation7 + $0xe8] sm:$0xff] }
 0x13d   :  { %v709_v37 = vadd.f32 %v697_v35, %v648_v45 }
 0x13f   :  { %745 = vmatmul.f32.vlgmr.msra.gmra.mxu1 %v709_v37 }
 0x141   :  { %v593_v2 = vpop.f32.mrf.mxu2 }
 0x142   :  { %v639_v61 = vpop.f32.mrf.mxu3  ;;  %v601_v21 = vadd.f32 %v593_v2, %v519_v10  ;;  %v900_v2 = vld [vmem:[#allocation7 + $0xd8] sm:$0xff] }
 0x143   :  { %v649_v63 = vadd.f32 %v639_v61, %v600_v60  ;;  %v514_v15 = vpop.f32.mrf.mxu1  ;;  %v903_v60 = vld [vmem:[#allocation7 + $0xf0] sm:$0xff] }
 0x144   :  { %v703_v51 = vpop.f32.mrf.mxu0  ;;  %v520_v23 = vadd.f32 %v514_v15, %v459_v16  ;;  %906 = vmatpush.msra.mxu3 %v903_v60  ;;  %v894_v16 = vld [vmem:[#allocation7 + $0xa8] sm:$0xff] }
 0x145   :  { %v710_v7 = vadd.f32 %v700_v48, %v649_v63  ;;  %v901_v63 = vld [vmem:[#allocation7 + $0xe0] sm:$0xff]  ;;  %v1092_v60 = vld [vmem:[#allocation7 + $0x228] sm:$0xff] }
 0x146   :  { %907 = vmatpush.msra.mxu3 %v902_v3 }
 0x147   :  { %748 = vmatmul.f32.gmra.mxu1 %v710_v7 }
 0x148   :  { %908 = vmatpush.msra.mxu3 %v901_v63  ;;  %v1619_v63 = vld [vmem:[%s2310_s5] ss:$0 sm:$0xff] }
 0x149   :  { %v596_v22 = vpop.f32.mrf.mxu2 }
 0x14a   :  { %v642_v11 = vpop.f32.mrf.mxu3  ;;  %v602_v28 = vadd.f32 %v596_v22, %v520_v23  ;;  %909 = vmatpush.msra.mxu3 %v900_v2  ;;  %v893_v22 = vld [vmem:[#allocation7 + $0xa0] sm:$0xff] }
 0x14b   :  { %v650_v12 = vadd.f32 %v642_v11, %v601_v21  ;;  %v896_v21 = vld [vmem:[#allocation7 + $0xb8] sm:$0xff]  ;;  %v1091_v2 = vld [vmem:[#allocation7 + $0x220] sm:$0xff] }
 0x14c   :  { %v706_v30 = vpop.f32.mrf.mxu0  ;;  %910 = vmatpush.msra.mxu3 %v899_v0 }
 0x14d   :  { %v711_v19 = vadd.f32 %v703_v51, %v650_v12  ;;  %v897_v51 = vld [vmem:[#allocation7 + $0xc0] sm:$0xff]  ;;  %v895_v12 = vld [vmem:[#allocation7 + $0xb0] sm:$0xff] }
 0x14f   :  { %751 = vmatmul.f32.gmra.mxu1 %v711_v19 }
 0x152   :  { %v645_v13 = vpop.f32.mrf.mxu3 }
 0x153   :  { %v651_v56 = vadd.f32 %v645_v13, %v602_v28  ;;  %v892_v28 = vld [vmem:[#allocation7 + $0x98] sm:$0xff]  ;;  %v891_v13 = vld [vmem:[#allocation7 + $0x90] sm:$0xff] }
 0x155   :  { %v712_v20 = vadd.f32 %v706_v30, %v651_v56  ;;  %v890_v56 = vld [vmem:[#allocation7 + $0x88] sm:$0xff] }
 0x157   :  { %754 = vmatmul.f32.gmra.mxu1 %v712_v20 }
 0x1bc   :  { %v746_v24 = vpop.f32.mrf.mxu1 }
 0x1c4   :  { %v749_v27 = vpop.f32.mrf.mxu1 }
 0x1c5   :  { %v758_v33 = vadd.f32 %v749_v27, %v746_v24  ;;  %v889_v27 = vld [vmem:[#allocation7 + $0x80] sm:$0xff] }
 0x1cc   :  { %v752_v32 = vpop.f32.mrf.mxu1 }
 0x1cd   :  { %v759_v34 = vadd.f32 %v758_v33, %v752_v32  ;;  %v1102_v33 = vld [vmem:[#allocation7 + $0x278] sm:$0xff] }
 0x1d4   :  { %v755_v31 = vpop.f32.mrf.mxu1 }
 0x1d5   :  { %v760_v35 = vadd.f32 %v759_v34, %v755_v31  ;;  %v1101_v34 = vld [vmem:[#allocation7 + $0x270] sm:$0xff]  ;;  %v1100_v31 = vld [vmem:[#allocation7 + $0x268] sm:$0xff] }
 0x1d7   :  { %v761_v36 = vrot.slane %v760_v35, 4 }
 0x1d9   :  { %v762_v4 = vadd.f32 %v761_v36, %v760_v35  ;;  %v1099_v35 = vld [vmem:[#allocation7 + $0x260] sm:$0xff] }
 0x1db   :  { %v763_v29 = vrot.slane %v762_v4, 2 }
 0x1dd   :  { %v764_v38 = vadd.f32 %v763_v29, %v762_v4  ;;  %v1098_v29 = vld [vmem:[#allocation7 + $0x258] sm:$0xff] }
 0x1df   :  { %v765_v39 = vrot.slane %v764_v38, 1 }
 0x1e1   :  { %v766_v40 = vadd.f32 %v765_v39, %v764_v38  ;;  %v1097_v38 = vld [vmem:[#allocation7 + $0x250] sm:$0xff] }
 0x1e3   :  { %v767_v41 = vmul.f32 0.001953125, %v766_v40  ;;  %v1096_v40 = vld [vmem:[#allocation7 + $0x248] sm:$0xff] }
 0x1e5   :  { %v2097_v42 = vsub.f32 %v709_v37, %v767_v41  ;;  %v2101_v44 = vsub.f32 %v710_v7, %v767_v41  ;;  %v2105_v46 = vsub.f32 %v711_v19, %v767_v41  ;;  %v2109_v48 = vsub.f32 %v712_v20, %v767_v41  ;;  %v898_v7 = vld [vmem:[#allocation7 + $0xc8] sm:$0xff] }
 0x1e6   :  { %911 = vmatpush.msra.mxu3 %v898_v7 }
 0x1e7   :  { %v772_v43 = vmul.f32 %v2097_v42, %v2097_v42  ;;  %v773_v45 = vmul.f32 %v2101_v44, %v2101_v44  ;;  %v774_v47 = vmul.f32 %v2105_v46, %v2105_v46  ;;  %v775_v37 = vmul.f32 %v2109_v48, %v2109_v48 }
 0x1e8   :  { %912 = vmatpush.msra.mxu3 %v897_v51 }
 0x1e9   :  { %792 = vmatmul.f32.vlgmr.msra.gmra.mxu2 %v772_v43  ;;  %v1095_v43 = vld [vmem:[#allocation7 + $0x240] sm:$0xff] }
 0x1ea   :  { %913 = vmatpush.msra.mxu3 %v896_v21  ;;  %v1088_v21 = vld [vmem:[#allocation7 + $0x208] sm:$0xff] }
 0x1ec   :  { %914 = vmatpush.msra.mxu3 %v895_v12 }
 0x1ee   :  { %915 = vmatpush.msra.mxu3 %v894_v16  ;;  %v1087_v16 = vld [vmem:[#allocation7 + $0x200] sm:$0xff] }
 0x1f0   :  { %916 = vmatpush.msra.mxu3 %v893_v22 }
 0x1f1   :  { %795 = vmatmul.f32.gmra.mxu2 %v773_v45 }
 0x1f2   :  { %917 = vmatpush.msra.mxu3 %v892_v28 }
 0x1f4   :  { %918 = vmatpush.msra.mxu3 %v891_v13 }
 0x1f6   :  { %919 = vmatpush.msra.mxu3 %v890_v56 }
 0x1f8   :  { %920 = vmatpush.msra.mxu3 %v889_v27  ;;  %v992_v27 = vld [vmem:[#allocation7 + $0x178] sm:$0xff] }
 0x1f9   :  { %798 = vmatmul.f32.gmra.mxu2 %v774_v47  ;;  %993 = vmatpush.msrb.mxu1 %v992_v27  ;;  %v1231_v27 = vld [vmem:[#allocation7 + $0x350] sm:$0xff] }
 0x1fa   :  { %1103 = vmatpush.msrb.mxu3 %v1102_v33 }
 0x1fc   :  { %1104 = vmatpush.msrb.mxu3 %v1101_v34 }
 0x1fe   :  { %1105 = vmatpush.msrb.mxu3 %v1100_v31  ;;  %v1053_v31 = vld [vmem:[#allocation7 + $0x1f8] sm:$0xff] }
 0x1ff   :  { %1054 = vmatpush.msrb.mxu2 %v1053_v31  ;;  %v1040_v31 = vld [vmem:[#allocation7 + $0x190] sm:$0xff] }
 0x200   :  { %1106 = vmatpush.msrb.mxu3 %v1099_v35  ;;  %v989_v35 = vld [vmem:[#allocation7 + $0x160] sm:$0xff] }
 0x201   :  { %801 = vmatmul.f32.gmra.mxu2 %v775_v37  ;;  %v826_v37 = vld [vmem:[%s2309_s4] sm:$0x1]  ;;  %s1777_s4 = smov 120  }
 0x202   :  { %1107 = vmatpush.msrb.mxu3 %v1098_v29  ;;  %v988_v29 = vld [vmem:[#allocation7 + $0x158] sm:$0xff] }
 0x204   :  { %1108 = vmatpush.msrb.mxu3 %v1097_v38  ;;  %v1051_v38 = vld [vmem:[#allocation7 + $0x1e8] sm:$0xff] }
 0x206   :  { %1109 = vmatpush.msrb.mxu3 %v1096_v40  ;;  %v887_v40 = vld [vmem:[#allocation7 + $0x70] sm:$0xff] }
 0x208   :  { %1110 = vmatpush.msrb.mxu3 %v1095_v43  ;;  %v987_v43 = vld [vmem:[#allocation7 + $0x150] sm:$0xff] }
 0x26c   :  { %v793_v49 = vpop.f32.mrf.mxu2 }
 0x274   :  { %v796_v9 = vpop.f32.mrf.mxu2 }
 0x275   :  { %v805_v5 = vadd.f32 %v796_v9, %v793_v49  ;;  %v1094_v49 = vld [vmem:[#allocation7 + $0x238] sm:$0xff]  ;;  %v1093_v9 = vld [vmem:[#allocation7 + $0x230] sm:$0xff] }
 0x276   :  { %1111 = vmatpush.msrb.mxu3 %v1094_v49  ;;  %v1049_v49 = vld [vmem:[#allocation7 + $0x1d8] sm:$0xff] }
 0x278   :  { %1112 = vmatpush.msrb.mxu3 %v1093_v9  ;;  %v885_v9 = vld [vmem:[#allocation7 + $0x60] sm:$0xff] }
 0x27a   :  { %1113 = vmatpush.msrb.mxu3 %v1092_v60  ;;  %v985_v60 = vld [vmem:[#allocation7 + $0x140] sm:$0xff] }
 0x27c   :  { %v799_v61 = vpop.f32.mrf.mxu2  ;;  %1114 = vmatpush.msrb.mxu3 %v1091_v2  ;;  %v983_v2 = vld [vmem:[#allocation7 + $0x130] sm:$0xff] }
 0x27d   :  { %v806_v8 = vadd.f32 %v805_v5, %v799_v61 }
 0x284   :  { %v802_v10 = vpop.f32.mrf.mxu2 }
 0x285   :  { %v807_v18 = vadd.f32 %v806_v8, %v802_v10  ;;  %v1090_v8 = vld [vmem:[#allocation7 + $0x218] sm:$0xff] }
 0x286   :  { %1115 = vmatpush.msrb.mxu3 %v1090_v8  ;;  %v980_v8 = vld [vmem:[#allocation7 + $0x118] sm:$0xff] }
 0x287   :  { %v808_v11 = vrot.slane %v807_v18, 4 }
 0x289   :  { %v809_v15 = vadd.f32 %v808_v11, %v807_v18  ;;  %v1089_v18 = vld [vmem:[#allocation7 + $0x210] sm:$0xff] }
 0x28a   :  { %1116 = vmatpush.msrb.mxu3 %v1089_v18  ;;  %v978_v18 = vld [vmem:[#allocation7 + $0x108] sm:$0xff] }
 0x28b   :  { %v810_v19 = vrot.slane %v809_v15, 2 }
 0x28c   :  { %1117 = vmatpush.msrb.mxu3 %v1088_v21 }
 0x28d   :  { %v811_v23 = vadd.f32 %v810_v19, %v809_v15 }
 0x28e   :  { %1118 = vmatpush.msrb.mxu3 %v1087_v16  ;;  %v1046_v16 = vld [vmem:[#allocation7 + $0x1c0] sm:$0xff] }
 0x28f   :  { %v812_v30 = vrot.slane %v811_v23, 1 }
 0x291   :  { %v813_v20 = vadd.f32 %v812_v30, %v811_v23 }
 0x293   :  { %v814_v24 = vmul.f32 0.001953125, %v813_v20 }
 0x295   :  { %v815_v32 = vadd.f32 1e-05, %v814_v24 }
 0x297   :  { %1621 = vrsqrt.f32 %v815_v32  ;;  %vm822_vm9 = vweird.f32 %v815_v32 }
 0x29d   :  { %v1622_v36 = vpop.eup %1621 }
 0x29e   :  { %v817_v4 = vmul.f32 %v1622_v36, %v815_v32  ;;  %vm823_vm8 = vweird.f32 %v1622_v36  ;;  %v991_v32 = vld [vmem:[#allocation7 + $0x170] sm:$0xff] }
 0x29f   :  { %vm824_vm10 = vmor %vm822_vm9, %vm823_vm8  ;;  %994 = vmatpush.msrb.mxu1 %v991_v32  ;;  %v878_v32 = vld [vmem:[#allocation7 + $0x28] sm:$0xff] }
 0x2a0   :  { %v818_v39 = vmul.f32 %v1622_v36, %v817_v4  ;;  %v888_v4 = vld [vmem:[#allocation7 + $0x78] sm:$0xff] }
 0x2a1   :  { %995 = vmatpush.msrb.mxu1 %v990_v17  ;;  %934 = vmatpush.msrb.mxu0 %v888_v4  ;;  %v1041_v17 = vld [vmem:[#allocation7 + $0x198] sm:$0xff]  ;;  %v1039_v4 = vld [vmem:[#allocation7 + $0x188] sm:$0xff] }
 0x2a2   :  { %v819_v41 = vmul.f32 0.5, %v818_v39 }
 0x2a3   :  { %996 = vmatpush.msrb.mxu1 %v989_v35  ;;  %935 = vmatpush.msrb.mxu0 %v887_v40  ;;  %v1229_v35 = vld [vmem:[#allocation7 + $0x340] sm:$0xff] }
 0x2a4   :  { %v820_v45 = vsub.f32 1.5, %v819_v41  ;;  %v1038_v40 = vld [vmem:[#allocation7 + $0x180] sm:$0xff] }
 0x2a5   :  { %997 = vmatpush.msrb.mxu1 %v988_v29  ;;  %v1228_v29 = vld [vmem:[#allocation7 + $0x338] sm:$0xff] }
 0x2a6   :  { %v821_v47 = vmul.f32 %v1622_v36, %v820_v45  ;;  %v1050_v45 = vld [vmem:[#allocation7 + $0x1e0] sm:$0xff] }
 0x2a7   :  { %998 = vmatpush.msrb.mxu1 %v987_v43  ;;  %v874_v43 = vld [vmem:[#allocation7 + $0x8] sm:$0xff] }
 0x2a8   :  { %v825_v26 = vsel %vm824_vm10, %v1622_v36, %v821_v47  ;;  %v1052_v36 = vld [vmem:[#allocation7 + $0x1f0] sm:$0xff]  ;;  %v886_v47 = vld [vmem:[#allocation7 + $0x68] sm:$0xff] }
 0x2a9   :  { %v827_v3 = vmul.f32 %v826_v37, %v825_v26  ;;  %1055 = vmatpush.msrb.mxu2 %v1052_v36  ;;  %v986_v37 = vld [vmem:[#allocation7 + $0x148] sm:$0xff]  ;;  %936 = vmatpush.msrb.mxu0 %v886_v47  ;;  %v876_v36 = vld [vmem:[#allocation7 + $0x18] sm:$0xff] }
 0x2aa   :  { %999 = vmatpush.msrb.mxu1 %v986_v37  ;;  %v1285_v47 = vld [vmem:[#allocation7 + $0x3f8] sm:$0xff]  ;;  %v873_v37 = vld [vmem:[#allocation7] sm:$0xff] }
 0x2ab   :  { %v828_v61 = vperm.slane %v827_v3, 0  ;;  %1056 = vmatpush.msrb.mxu2 %v1051_v38  ;;  %v984_v3 = vld [vmem:[#allocation7 + $0x138] sm:$0xff]  ;;  %937 = vmatpush.msrb.mxu0 %v885_v9  ;;  %v875_v38 = vld [vmem:[#allocation7 + $0x10] sm:$0xff] }
 0x2ac   :  { %1000 = vmatpush.msrb.mxu1 %v985_v60  ;;  %v1284_v9 = vld [vmem:[#allocation7 + $0x3f0] sm:$0xff]  ;;  %v1163_v60 = vld [vmem:[#allocation7 + $0x2f8] sm:$0xff] }
 0x2ad   :  { %v832_v0 = vmul.f32 %v828_v61, %v2109_v48  ;;  %v829_v5 = vmul.f32 %v828_v61, %v2097_v42  ;;  %v830_v7 = vmul.f32 %v828_v61, %v2101_v44  ;;  %v831_v48 = vmul.f32 %v828_v61, %v2105_v46  ;;  %1057 = vmatpush.msrb.mxu2 %v1050_v45  ;;  %v1048_v61 = vld [vmem:[#allocation7 + $0x1d0] sm:$0xff]  ;;  %v1226_v45 = vld [vmem:[#allocation7 + $0x328] sm:$0xff] }
 0x2ae   :  { %1001 = vmatpush.msrb.mxu1 %v984_v3  ;;  %v1346_v3 = vld [vmem:[#allocation7 + $0x478] sm:$0xff] }
 0x2af   :  { %v837_v10 = vadd.f32 %v1619_v63, %v829_v5  ;;  %v840_v51 = vadd.f32 %v1619_v63, %v832_v0  ;;  %v838_v15 = vadd.f32 %v1619_v63, %v830_v7  ;;  %v839_v46 = vadd.f32 %v1619_v63, %v831_v48  ;;  %1058 = vmatpush.msrb.mxu2 %v1049_v49  ;;  %v982_v0 = vld [vmem:[#allocation7 + $0x128] sm:$0xff]  ;;  %v981_v7 = vld [vmem:[#allocation7 + $0x120] sm:$0xff]  ;;  %v1236_v48 = vld [vmem:[#allocation7 + $0x378] sm:$0xff] }
 0x2b0   :  { %1002 = vmatpush.msrb.mxu1 %v983_v2  ;;  %v1225_v49 = vld [vmem:[#allocation7 + $0x320] sm:$0xff]  ;;  %v1162_v2 = vld [vmem:[#allocation7 + $0x2f0] sm:$0xff] }
 0x2b1   :  { %v2122_v11 = vmax.f32 %v837_v10, 0.0  ;;  %v2124_v12 = vmax.f32 %v840_v51, 0.0  ;;  %v2133_v22 = vmax.f32 %v838_v15, 0.0  ;;  %v2144_v13 = vmax.f32 %v839_v46, 0.0  ;;  %1059 = vmatpush.msrb.mxu2 %v1048_v61  ;;  %v979_v51 = vld [vmem:[#allocation7 + $0x110] sm:$0xff]  ;;  %v977_v15 = vld [vmem:[#allocation7 + $0x100] sm:$0xff] }
 0x2b2   :  { %1003 = vmatpush.msrb.mxu1 %v982_v0  ;;  %v881_v46 = vld [vmem:[#allocation7 + $0x40] sm:$0xff]  ;;  %v1224_v61 = vld [vmem:[#allocation7 + $0x318] sm:$0xff]  ;;  %v1345_v0 = vld [vmem:[#allocation7 + $0x470] sm:$0xff] }
 0x2b3   :  { %1026 = vrot.lane.b32.xlu0 %v2122_v11, %s1771_s14  ;;  %v847_v42 = vrot.slane %v2122_v11, 7  ;;  %v850_v44 = vrot.slane %v2124_v12, 7  ;;  %v848_v28 = vrot.slane %v2133_v22, 7  ;;  %v849_v6 = vrot.slane %v2144_v13, 7 }
 0x2b4   :  { %v1197_v33 = vrot.slane %v2122_v11, 1  ;;  %v1198_v34 = vrot.slane %v2133_v22, 1  ;;  %v1199_v41 = vrot.slane %v2144_v13, 1  ;;  %v1200_v5 = vrot.slane %v2124_v12, 1  ;;  %1004 = vmatpush.msrb.mxu1 %v981_v7  ;;  %v1282_v7 = vld [vmem:[#allocation7 + $0x3e0] sm:$0xff] }
 0x2b5   :  { %v854_v19 = vsel %vm166_vm0, %v850_v44, %v847_v42  ;;  %v853_v30 = vsel %vm166_vm0, %v847_v42, %v848_v28  ;;  %v852_v56 = vsel %vm166_vm0, %v848_v28, %v849_v6  ;;  %v851_v24 = vsel %vm166_vm0, %v849_v6, %v850_v44  ;;  %v884_v44 = vld [vmem:[#allocation7 + $0x58] sm:$0xff]  ;;  %v1044_v28 = vld [vmem:[#allocation7 + $0x1b0] sm:$0xff]  ;;  %v1043_v6 = vld [vmem:[#allocation7 + $0x1a8] sm:$0xff] }
 0x2b6   :  { %1549 = vmatmul.msk.f32.vlgmr.msra.gmra.mxu3 %vm1859_vm1, %v854_v19  ;;  %v855_v23 = vsel %vm1859_vm1, %v854_v19, 0.0  ;;  %v857_v20 = vsel %vm1891_vm2, %v852_v56, 0.0  ;;  %v2176_v39 = vsel %vm525_vm3, %v1197_v33, %v1198_v34  ;;  %v2187_v26 = vsel %vm525_vm3, %v1198_v34, %v1199_v41  ;;  %1005 = vmatpush.msrb.mxu1 %v980_v8  ;;  %v1235_v19 = vld [vmem:[#allocation7 + $0x370] sm:$0xff]  ;;  %v877_v34 = vld [vmem:[#allocation7 + $0x20] sm:$0xff]  ;;  %v1161_v8 = vld [vmem:[#allocation7 + $0x2e8] sm:$0xff] }
 0x2b7   :  { %963 = vrot.lane.b32.xlu2 %v855_v23, %s1777_s4  ;;  %859 = vrot.lane.b32.xlu1 %v855_v23, %s1771_s14  ;;  %v1206_v63 = vsel %vm1920_vm4, %v2187_v26, 0.0  ;;  %v2201_v10 = vsel %vm525_vm3, %v1199_v41, %v1200_v5  ;;  %v2213_v21 = vsel %vm525_vm3, %v1200_v5, %v1197_v33  ;;  %v1234_v23 = vld [vmem:[#allocation7 + $0x368] sm:$0xff]  ;;  %v1227_v41 = vld [vmem:[#allocation7 + $0x330] sm:$0xff] }
 0x2b8   :  { %1006 = vmatpush.msrb.mxu1 %v979_v51  ;;  %v1208_v42 = vsel %vm1952_vm5, %v2213_v21, 0.0  ;;  %938 = vmatpush.msrb.mxu0 %v884_v44  ;;  %v1230_v33 = vld [vmem:[#allocation7 + $0x348] sm:$0xff]  ;;  %v1223_v5 = vld [vmem:[#allocation7 + $0x310] sm:$0xff]  ;;  %v1343_v44 = vld [vmem:[#allocation7 + $0x460] sm:$0xff] }
 0x2b9   :  { %1347 = vmatpush.msra.mxu3 %v1346_v3  ;;  %v1344_v51 = vld [vmem:[#allocation7 + $0x468] sm:$0xff]  ;;  %v1627_v3 = vld [vmem:[#allocation8 + $0x70] sm:$0xff] }
 0x2ba   :  { %1007 = vmatpush.msrb.mxu1 %v978_v18  ;;  %939 = vmatpush.msrb.mxu0 %v883_v1  ;;  %v1222_v18 = vld [vmem:[#allocation7 + $0x308] sm:$0xff] }
 0x2bb   :  { %1028 = vrot.lane.b32.xlu0 %v2133_v22, %s1771_s14  ;;  %1348 = vmatpush.msra.mxu3 %v1345_v0  ;;  %v1630_v0 = vld [vmem:[#allocation8 + $0x28] sm:$0xff] }
 0x2bc   :  { %1008 = vmatpush.msrb.mxu1 %v977_v15  ;;  %v1281_v15 = vld [vmem:[#allocation7 + $0x3d8] sm:$0xff] }
 0x2bd   :  { %1349 = vmatpush.msra.mxu3 %v1344_v51  ;;  %v1632_v51 = vld [vmem:[#allocation8 + $0x58] sm:$0xff] }
 0x2be   :  { %924 = vmatmul.f32.gmra.mxu3 %v853_v30  ;;  %1237 = vmatpush.msra.mxu1 %v1236_v48  ;;  %v1280_v48 = vld [vmem:[#allocation7 + $0x3d0] sm:$0xff] }
 0x2bf   :  { %965 = vrot.lane.b32.xlu2 %v853_v30, %s1777_s4  ;;  %861 = vrot.lane.b32.xlu1 %v853_v30, %s1771_s14  ;;  %v880_v30 = vld [vmem:[#allocation7 + $0x38] sm:$0xff] }
 0x2c0   :  { %1238 = vmatpush.msra.mxu1 %v1235_v19  ;;  %1350 = vmatpush.msra.mxu3 %v1343_v44  ;;  %v1342_v19 = vld [vmem:[#allocation7 + $0x458] sm:$0xff]  ;;  %v1635_v44 = vld [vmem:[#allocation8 + $0x48] sm:$0xff] }
 0x2c2   :  { %1239 = vmatpush.msra.mxu1 %v1234_v23  ;;  %v1341_v23 = vld [vmem:[#allocation7 + $0x450] sm:$0xff]  ;;  %1351 = vmatpush.msra.mxu3 %v1342_v19 }
 0x2c3   :  { %1030 = vrot.lane.b32.xlu0 %v2144_v13, %s1771_s14 }
 0x2c4   :  { %1352 = vmatpush.msra.mxu3 %v1341_v23 }
 0x2c6   :  { %1550 = vmatmul.msk.f32.gmra.mxu3 %vm1891_vm2, %v852_v56  ;;  %v1232_v56 = vld [vmem:[#allocation7 + $0x358] sm:$0xff] }
 0x2c7   :  { %967 = vrot.lane.b32.xlu2 %v857_v20, %s1777_s4  ;;  %863 = vrot.lane.b32.xlu1 %v857_v20, %s1771_s14  ;;  %v879_v20 = vld [vmem:[#allocation7 + $0x30] sm:$0xff] }
 0x2cb   :  { %1032 = vrot.lane.b32.xlu0 %v2124_v12, %s1771_s14 }
 0x2ce   :  { %930 = vmatmul.f32.gmra.mxu3 %v851_v24 }
 0x2cf   :  { %969 = vrot.lane.b32.xlu2 %v851_v24, %s1777_s4  ;;  %865 = vrot.lane.b32.xlu1 %v851_v24, %s1771_s14  ;;  %v1042_v24 = vld [vmem:[#allocation7 + $0x1a0] sm:$0xff] }
 0x2d3   :  { %1136 = vrot.lane.b32.xlu0 %v2122_v11, %s1777_s4 }
 0x2d6   :  { %1119 = vmatmul.f32.vlgmr.msrb.gmra.mxu3 %v2122_v11  ;;  %v1047_v11 = vld [vmem:[#allocation7 + $0x1c8] sm:$0xff] }
 0x2d7   :  { %1209 = vrot.lane.b32.xlu2 %v2176_v39, %s1771_s14  ;;  %1319 = vrot.lane.b32.xlu1 %v2176_v39, %s1777_s4 }
 0x2d8   :  { %1060 = vmatpush.msrb.mxu2 %v1047_v11  ;;  %v1221_v11 = vld [vmem:[#allocation7 + $0x300] sm:$0xff] }
 0x2da   :  { %1061 = vmatpush.msrb.mxu2 %v1046_v16  ;;  %v1159_v16 = vld [vmem:[#allocation7 + $0x2d8] sm:$0xff] }
 0x2db   :  { %1138 = vrot.lane.b32.xlu0 %v2133_v22, %s1777_s4 }
 0x2de   :  { %1122 = vmatmul.f32.gmra.mxu3 %v2133_v22  ;;  %v882_v22 = vld [vmem:[#allocation7 + $0x48] sm:$0xff] }
 0x2df   :  { %1211 = vrot.lane.b32.xlu2 %v1206_v63, %s1771_s14  ;;  %1321 = vrot.lane.b32.xlu1 %v1206_v63, %s1777_s4  ;;  %v1283_v63 = vld [vmem:[#allocation7 + $0x3e8] sm:$0xff] }
 0x2e0   :  { %940 = vmatpush.msrb.mxu0 %v882_v22  ;;  %v1279_v22 = vld [vmem:[#allocation7 + $0x3c8] sm:$0xff] }
 0x2e2   :  { %941 = vmatpush.msrb.mxu0 %v881_v46  ;;  %v1278_v46 = vld [vmem:[#allocation7 + $0x3c0] sm:$0xff] }
 0x2e3   :  { %1140 = vrot.lane.b32.xlu0 %v2144_v13, %s1777_s4 }
 0x2e4   :  { %942 = vmatpush.msrb.mxu0 %v880_v30  ;;  %v1277_v30 = vld [vmem:[#allocation7 + $0x3b8] sm:$0xff] }
 0x2e6   :  { %1125 = vmatmul.f32.gmra.mxu3 %v2144_v13  ;;  %v1233_v13 = vld [vmem:[#allocation7 + $0x360] sm:$0xff]  ;;  %943 = vmatpush.msrb.mxu0 %v879_v20 }
 0x2e7   :  { %1213 = vrot.lane.b32.xlu2 %v2201_v10, %s1771_s14  ;;  %1323 = vrot.lane.b32.xlu1 %v2201_v10, %s1777_s4 }
 0x2e8   :  { %1240 = vmatpush.msra.mxu1 %v1233_v13  ;;  %944 = vmatpush.msrb.mxu0 %v878_v32  ;;  %v1340_v13 = vld [vmem:[#allocation7 + $0x448] sm:$0xff] }
 0x2e9   :  { %1353 = vmatpush.msra.mxu3 %v1340_v13  ;;  %v1275_v32 = vld [vmem:[#allocation7 + $0x3a8] sm:$0xff]  ;;  %v1640_v13 = vld [vmem:[#allocation8] sm:$0xff] }
 0x2ea   :  { %1241 = vmatpush.msra.mxu1 %v1232_v56  ;;  %945 = vmatpush.msrb.mxu0 %v877_v34  ;;  %v1339_v56 = vld [vmem:[#allocation7 + $0x440] sm:$0xff]  ;;  %v1336_v34 = vld [vmem:[#allocation7 + $0x428] sm:$0xff] }
 0x2eb   :  { %1142 = vrot.lane.b32.xlu0 %v2124_v12, %s1777_s4  ;;  %1354 = vmatpush.msra.mxu3 %v1339_v56 }
 0x2ec   :  { %1242 = vmatpush.msra.mxu1 %v1231_v27  ;;  %946 = vmatpush.msrb.mxu0 %v876_v36  ;;  %v1338_v27 = vld [vmem:[#allocation7 + $0x438] sm:$0xff]  ;;  %v1272_v36 = vld [vmem:[#allocation7 + $0x390] sm:$0xff] }
 0x2ed   :  { %1355 = vmatpush.msra.mxu3 %v1338_v27 }
 0x2ee   :  { %1128 = vmatmul.f32.gmra.mxu3 %v2124_v12  ;;  %v1045_v12 = vld [vmem:[#allocation7 + $0x1b8] sm:$0xff]  ;;  %1243 = vmatpush.msra.mxu1 %v1230_v33  ;;  %v1274_v33 = vld [vmem:[#allocation7 + $0x3a0] sm:$0xff] }
 0x2ef   :  { %1215 = vrot.lane.b32.xlu2 %v1208_v42, %s1771_s14  ;;  %1325 = vrot.lane.b32.xlu1 %v1208_v42, %s1777_s4  ;;  %v1160_v42 = vld [vmem:[#allocation7 + $0x2e0] sm:$0xff] }
 0x2f0   :  { %1062 = vmatpush.msrb.mxu2 %v1045_v12  ;;  %1244 = vmatpush.msra.mxu1 %v1229_v35  ;;  %v1158_v12 = vld [vmem:[#allocation7 + $0x2d0] sm:$0xff]  ;;  %v1152_v35 = vld [vmem:[#allocation7 + $0x2a0] sm:$0xff] }
 0x2f1   :  { %947 = vmatpush.msrb.mxu0 %v875_v38  ;;  %v1271_v38 = vld [vmem:[#allocation7 + $0x388] sm:$0xff] }
 0x2f2   :  { %1063 = vmatpush.msrb.mxu2 %v1044_v28  ;;  %1245 = vmatpush.msra.mxu1 %v1228_v29  ;;  %v1157_v28 = vld [vmem:[#allocation7 + $0x2c8] sm:$0xff]  ;;  %v1334_v29 = vld [vmem:[#allocation7 + $0x418] sm:$0xff] }
 0x2f3   :  { %948 = vmatpush.msrb.mxu0 %v874_v43 }
 0x2f4   :  { %1064 = vmatpush.msrb.mxu2 %v1043_v6  ;;  %1246 = vmatpush.msra.mxu1 %v1227_v41  ;;  %v1156_v6 = vld [vmem:[#allocation7 + $0x2c0] sm:$0xff] }
 0x2f5   :  { %949 = vmatpush.msrb.mxu0 %v873_v37  ;;  %v1270_v41 = vld [vmem:[#allocation7 + $0x380] sm:$0xff] }
 0x2f6   :  { %1065 = vmatpush.msrb.mxu2 %v1042_v24  ;;  %1247 = vmatpush.msra.mxu1 %v1226_v45  ;;  %v1276_v24 = vld [vmem:[#allocation7 + $0x3b0] sm:$0xff]  ;;  %v1332_v45 = vld [vmem:[#allocation7 + $0x408] sm:$0xff]  ;;  %v1331_v37 = vld [vmem:[#allocation7 + $0x400] sm:$0xff] }
 0x2f7   :  { %1164 = vmatpush.msra.mxu0 %v1163_v60 }
 0x2f8   :  { %1066 = vmatpush.msrb.mxu2 %v1041_v17  ;;  %1248 = vmatpush.msra.mxu1 %v1225_v49  ;;  %v1337_v17 = vld [vmem:[#allocation7 + $0x430] sm:$0xff]  ;;  %v1625_v49 = vld [vmem:[#allocation8 + $0x78] sm:$0xff] }
 0x2f9   :  { %1165 = vmatpush.msra.mxu0 %v1162_v2  ;;  %1356 = vmatpush.msra.mxu3 %v1337_v17  ;;  %v1629_v2 = vld [vmem:[#allocation8 + $0x68] sm:$0xff] }
 0x2fa   :  { %1067 = vmatpush.msrb.mxu2 %v1040_v31  ;;  %1249 = vmatpush.msra.mxu1 %v1224_v61  ;;  %v1273_v31 = vld [vmem:[#allocation7 + $0x398] sm:$0xff] }
 0x2fb   :  { %1166 = vmatpush.msra.mxu0 %v1161_v8  ;;  %1357 = vmatpush.msra.mxu3 %v1336_v34  ;;  %v1631_v8 = vld [vmem:[#allocation8 + $0x60] sm:$0xff] }
 0x2fc   :  { %1068 = vmatpush.msrb.mxu2 %v1039_v4  ;;  %1250 = vmatpush.msra.mxu1 %v1223_v5 }
 0x2fd   :  { %1167 = vmatpush.msra.mxu0 %v1160_v42  ;;  %v1634_v42 = vld [vmem:[#allocation8 + $0x50] sm:$0xff] }
 0x2fe   :  { %1069 = vmatpush.msrb.mxu2 %v1038_v40  ;;  %1251 = vmatpush.msra.mxu1 %v1222_v18  ;;  %v1333_v40 = vld [vmem:[#allocation7 + $0x410] sm:$0xff]  ;;  %v1633_v18 = vld [vmem:[#allocation8 + $0x20] sm:$0xff] }
 0x2ff   :  { %1168 = vmatpush.msra.mxu0 %v1159_v16 }
 0x300   :  { %1286 = vmatpush.msra.mxu2 %v1285_v47  ;;  %1252 = vmatpush.msra.mxu1 %v1221_v11  ;;  %v1148_v47 = vld [vmem:[#allocation7 + $0x280] sm:$0xff]  ;;  %v1636_v11 = vld [vmem:[#allocation8 + $0x18] sm:$0xff] }
 0x301   :  { %1169 = vmatpush.msra.mxu0 %v1158_v12  ;;  %v1639_v12 = vld [vmem:[#allocation8 + $0x8] sm:$0xff] }
 0x302   :  { %1287 = vmatpush.msra.mxu2 %v1284_v9 }
 0x303   :  { %1170 = vmatpush.msra.mxu0 %v1157_v28 }
 0x304   :  { %1288 = vmatpush.msra.mxu2 %v1283_v63  ;;  %v1628_v63 = vld [vmem:[#allocation8 + $0x30] sm:$0xff] }
 0x305   :  { %1171 = vmatpush.msra.mxu0 %v1156_v6 }
 0x306   :  { %1289 = vmatpush.msra.mxu2 %v1282_v7 }
 0x308   :  { %1290 = vmatpush.msra.mxu2 %v1281_v15 }
 0x30a   :  { %1291 = vmatpush.msra.mxu2 %v1280_v48 }
 0x30c   :  { %1292 = vmatpush.msra.mxu2 %v1279_v22  ;;  %v1638_v22 = vld [vmem:[#allocation8 + $0x10] sm:$0xff] }
 0x30e   :  { %1293 = vmatpush.msra.mxu2 %v1278_v46 }
 0x310   :  { %1294 = vmatpush.msra.mxu2 %v1277_v30 }
 0x311   :  { %v964_v1 = vpop.permute.xlu2 %963 }
 0x312   :  { %1555 = vmatmul.msk.f32.vlgmr.msrb.gmra.mxu1 %vm846_vm11, %v964_v1  ;;  %1295 = vmatpush.msra.mxu2 %v1276_v24  ;;  %v1637_v1 = vld [vmem:[#allocation8 + $0x40] sm:$0xff] }
 0x313   :  { %1427 = vmatpush.msrb.mxu1 %v2059_v52  ;;  %v1155_v52 = vld [vmem:[#allocation7 + $0x2b8] sm:$0xff] }
 0x314   :  { %1172 = vmatpush.msra.mxu0 %v1155_v52  ;;  %1296 = vmatpush.msra.mxu2 %v1275_v32 }
 0x315   :  { %1428 = vmatpush.msrb.mxu1 %v2061_v50  ;;  %v1154_v50 = vld [vmem:[#allocation7 + $0x2b0] sm:$0xff] }
 0x316   :  { %1173 = vmatpush.msra.mxu0 %v1154_v50  ;;  %1297 = vmatpush.msra.mxu2 %v1274_v33 }
 0x317   :  { %1429 = vmatpush.msrb.mxu1 %v2069_v53  ;;  %v1153_v53 = vld [vmem:[#allocation7 + $0x2a8] sm:$0xff] }
 0x318   :  { %1174 = vmatpush.msra.mxu0 %v1153_v53  ;;  %1298 = vmatpush.msra.mxu2 %v1273_v31 }
 0x319   :  { %v966_v20 = vpop.permute.xlu2 %965  ;;  %1430 = vmatpush.msrb.mxu1 %v2073_v57  ;;  %v1335_v57 = vld [vmem:[#allocation7 + $0x420] sm:$0xff] }
 0x31a   :  { %1556 = vmatmul.msk.f32.gmra.mxu1 %vm846_vm11, %v966_v20  ;;  %1175 = vmatpush.msra.mxu0 %v1152_v35 }
 0x31b   :  { %1431 = vmatpush.msrb.mxu1 %v2075_v58  ;;  %1358 = vmatpush.msra.mxu3 %v1335_v57  ;;  %v1151_v58 = vld [vmem:[#allocation7 + $0x298] sm:$0xff] }
 0x31c   :  { %1299 = vmatpush.msra.mxu2 %v1272_v36  ;;  %1176 = vmatpush.msra.mxu0 %v1151_v58 }
 0x31d   :  { %1432 = vmatpush.msrb.mxu1 %v2079_v59  ;;  %v1150_v59 = vld [vmem:[#allocation7 + $0x290] sm:$0xff]  ;;  %1359 = vmatpush.msra.mxu3 %v1334_v29 }
 0x31e   :  { %1300 = vmatpush.msra.mxu2 %v1271_v38  ;;  %1177 = vmatpush.msra.mxu0 %v1150_v59 }
 0x31f   :  { %1433 = vmatpush.msrb.mxu1 %v2085_v14  ;;  %v1149_v14 = vld [vmem:[#allocation7 + $0x288] sm:$0xff]  ;;  %1360 = vmatpush.msra.mxu3 %v1333_v40 }
 0x320   :  { %1301 = vmatpush.msra.mxu2 %v1270_v41  ;;  %1178 = vmatpush.msra.mxu0 %v1149_v14 }
 0x321   :  { %v968_v4 = vpop.permute.xlu2 %967  ;;  %1434 = vmatpush.msrb.mxu1 %v2089_v62  ;;  %1361 = vmatpush.msra.mxu3 %v1332_v45  ;;  %v2239_v62 = vld [vmem:[#allocation8 + $0x38] sm:$0xff] }
 0x322   :  { %1557 = vmatmul.msk.f32.gmra.mxu1 %vm846_vm11, %v968_v4  ;;  %1179 = vmatpush.msra.mxu0 %v1148_v47 }
 0x323   :  { %1435 = vmatpush.msrb.mxu1 %v2239_v62  ;;  %1362 = vmatpush.msra.mxu3 %v1331_v37 }
 0x325   :  { %v1027_v43 = vpop.permute.xlu0 %1026  ;;  %1593 = vmatpush.msrb.mxu3 %v1625_v49  ;;  %1436 = vmatpush.msrb.mxu1 %v1628_v63 }
 0x326   :  { %1559 = vmatmul.msk.f32.vlgmr.msrb.gmra.mxu2 %vm845_vm12, %v1027_v43 }
 0x327   :  { %1577 = vmatpush.msrb.mxu2 %v1625_v49  ;;  %1594 = vmatpush.msrb.mxu3 %v1627_v3 }
 0x328   :  { %1437 = vmatpush.msrb.mxu1 %v1630_v0 }
 0x329   :  { %v860_v9 = vpop.permute.xlu1 %859  ;;  %v970_v60 = vpop.permute.xlu2 %969  ;;  %1578 = vmatpush.msrb.mxu2 %v1627_v3  ;;  %1595 = vmatpush.msrb.mxu3 %v1629_v2 }
 0x32a   :  { %1551 = vmatmul.msk.f32.vlgmr.msrb.gmra.mxu0 %vm845_vm12, %v860_v9  ;;  %1558 = vmatmul.msk.f32.gmra.mxu1 %vm846_vm11, %v970_v60 }
 0x32b   :  { %1380 = vmatpush.msrb.mxu0 %v1625_v49  ;;  %1579 = vmatpush.msrb.mxu2 %v1629_v2 }
 0x32c   :  { %1596 = vmatpush.msrb.mxu3 %v1631_v8  ;;  %1438 = vmatpush.msrb.mxu1 %v1633_v18 }
 0x32d   :  { %v1029_v61 = vpop.permute.xlu0 %1028  ;;  %1381 = vmatpush.msrb.mxu0 %v1627_v3  ;;  %1580 = vmatpush.msrb.mxu2 %v1631_v8 }
 0x32e   :  { %1560 = vmatmul.msk.f32.gmra.mxu2 %vm845_vm12, %v1029_v61  ;;  %1597 = vmatpush.msrb.mxu3 %v1632_v51 }
 0x32f   :  { %1382 = vmatpush.msrb.mxu0 %v1629_v2  ;;  %1581 = vmatpush.msrb.mxu2 %v1632_v51 }
 0x330   :  { %1598 = vmatpush.msrb.mxu3 %v1634_v42  ;;  %1439 = vmatpush.msrb.mxu1 %v1636_v11 }
 0x331   :  { %v1210_v5 = vpop.permute.xlu2 %1209  ;;  %v862_v7 = vpop.permute.xlu1 %861  ;;  %1383 = vmatpush.msrb.mxu0 %v1631_v8  ;;  %1582 = vmatpush.msrb.mxu2 %v1634_v42 }
 0x332   :  { %1552 = vmatmul.msk.f32.gmra.mxu0 %vm845_vm12, %v862_v7  ;;  %1567 = vmatmul.msk.f32.vlgmr.msra.gmra.mxu1 %vm845_vm12, %v1210_v5 }
 0x333   :  { %1384 = vmatpush.msrb.mxu0 %v1632_v51  ;;  %1583 = vmatpush.msrb.mxu2 %v1635_v44 }
 0x334   :  { %1599 = vmatpush.msrb.mxu3 %v1635_v44  ;;  %1440 = vmatpush.msrb.mxu1 %v1638_v22 }
 0x335   :  { %v1031_v15 = vpop.permute.xlu0 %1030  ;;  %1385 = vmatpush.msrb.mxu0 %v1634_v42  ;;  %1584 = vmatpush.msrb.mxu2 %v1637_v1 }
 0x336   :  { %1561 = vmatmul.msk.f32.gmra.mxu2 %vm845_vm12, %v1031_v15  ;;  %1600 = vmatpush.msrb.mxu3 %v1637_v1 }
 0x337   :  { %1386 = vmatpush.msrb.mxu0 %v1635_v44  ;;  %1585 = vmatpush.msrb.mxu2 %v2239_v62 }
 0x338   :  { %1601 = vmatpush.msrb.mxu3 %v2239_v62  ;;  %1441 = vmatpush.msrb.mxu1 %v1639_v12 }
 0x339   :  { %v1212_v48 = vpop.permute.xlu2 %1211  ;;  %v864_v16 = vpop.permute.xlu1 %863  ;;  %1387 = vmatpush.msrb.mxu0 %v1637_v1  ;;  %1586 = vmatpush.msrb.mxu2 %v1628_v63 }
 0x33a   :  { %1568 = vmatmul.msk.f32.gmra.mxu1 %vm845_vm12, %v1212_v48  ;;  %1553 = vmatmul.msk.f32.gmra.mxu0 %vm845_vm12, %v864_v16 }
 0x33b   :  { %1388 = vmatpush.msrb.mxu0 %v2239_v62  ;;  %1587 = vmatpush.msrb.mxu2 %v1630_v0 }
 0x33c   :  { %1602 = vmatpush.msrb.mxu3 %v1628_v63  ;;  %1442 = vmatpush.msrb.mxu1 %v1640_v13 }
 0x33d   :  { %v1033_v19 = vpop.permute.xlu0 %1032  ;;  %1389 = vmatpush.msrb.mxu0 %v1628_v63  ;;  %1588 = vmatpush.msrb.mxu2 %v1633_v18 }
 0x33e   :  { %1562 = vmatmul.msk.f32.gmra.mxu2 %vm845_vm12, %v1033_v19  ;;  %1603 = vmatpush.msrb.mxu3 %v1630_v0 }
 0x33f   :  { %1390 = vmatpush.msrb.mxu0 %v1630_v0  ;;  %1589 = vmatpush.msrb.mxu2 %v1636_v11 }
 0x340   :  { %1604 = vmatpush.msrb.mxu3 %v1633_v18 }
 0x341   :  { %v1214_v23 = vpop.permute.xlu2 %1213  ;;  %v866_v46 = vpop.permute.xlu1 %865  ;;  %1391 = vmatpush.msrb.mxu0 %v1633_v18  ;;  %1590 = vmatpush.msrb.mxu2 %v1638_v22 }
 0x342   :  { %1569 = vmatmul.msk.f32.gmra.mxu1 %vm845_vm12, %v1214_v23  ;;  %1554 = vmatmul.msk.f32.gmra.mxu0 %vm845_vm12, %v866_v46 }
 0x343   :  { %1392 = vmatpush.msrb.mxu0 %v1636_v11  ;;  %1591 = vmatpush.msrb.mxu2 %v1639_v12 }
 0x344   :  { %1605 = vmatpush.msrb.mxu3 %v1636_v11 }
 0x345   :  { %v1137_v28 = vpop.permute.xlu0 %1136  ;;  %1393 = vmatpush.msrb.mxu0 %v1638_v22  ;;  %1592 = vmatpush.msrb.mxu2 %v1640_v13 }
 0x346   :  { %1302 = vmatmul.f32.vlgmr.msra.gmra.mxu2 %v2176_v39  ;;  %1606 = vmatpush.msrb.mxu3 %v1638_v22 }
 0x347   :  { %1394 = vmatpush.msrb.mxu0 %v1639_v12 }
 0x348   :  { %1607 = vmatpush.msrb.mxu3 %v1639_v12 }
 0x349   :  { %v1216_v30 = vpop.permute.xlu2 %1215  ;;  %v1320_v6 = vpop.permute.xlu1 %1319  ;;  %1395 = vmatpush.msrb.mxu0 %v1640_v13 }
 0x34a   :  { %1570 = vmatmul.msk.f32.gmra.mxu1 %vm845_vm12, %v1216_v30  ;;  %1563 = vmatmul.msk.f32.vlgmr.msra.gmra.mxu0 %vm846_vm11, %v1137_v28 }
 0x34b   :  { %1573 = vmatmul.msk.f32.vlgmr.msra.gmra.mxu3 %vm846_vm11, %v1320_v6 }
 0x34c   :  { %1608 = vmatpush.msrb.mxu3 %v1640_v13 }
 0x34d   :  { %v1139_v39 = vpop.permute.xlu0 %1138 }
 0x34e   :  { %1571 = vmatmul.msk.f32.gmra.mxu2 %vm1920_vm4, %v2187_v26 }
 0x351   :  { %v1322_v56 = vpop.permute.xlu1 %1321 }
 0x352   :  { %1564 = vmatmul.msk.f32.gmra.mxu0 %vm846_vm11, %v1139_v39 }
 0x353   :  { %1574 = vmatmul.msk.f32.gmra.mxu3 %vm846_vm11, %v1322_v56 }
 0x355   :  { %v1141_v20 = vpop.permute.xlu0 %1140 }
 0x356   :  { %1308 = vmatmul.f32.gmra.mxu2 %v2201_v10  ;;  %v922_v10 = vpop.f32.mrf.mxu3 }
 0x359   :  { %v1324_v24 = vpop.permute.xlu1 %1323 }
 0x35a   :  { %1565 = vmatmul.msk.f32.gmra.mxu0 %vm846_vm11, %v1141_v20 }
 0x35b   :  { %1575 = vmatmul.msk.f32.gmra.mxu3 %vm846_vm11, %v1324_v24 }
 0x35d   :  { %v1143_v25 = vpop.permute.xlu0 %1142 }
 0x35e   :  { %1572 = vmatmul.msk.f32.gmra.mxu2 %vm1952_vm5, %v2213_v21  ;;  %v925_v52 = vpop.f32.mrf.mxu3 }
 0x361   :  { %v1326_v26 = vpop.permute.xlu1 %1325 }
 0x362   :  { %1566 = vmatmul.msk.f32.gmra.mxu0 %vm846_vm11, %v1143_v25 }
 0x363   :  { %1576 = vmatmul.msk.f32.gmra.mxu3 %vm846_vm11, %v1326_v26 }
 0x366   :  { %v928_v27 = vpop.f32.mrf.mxu3 }
 0x36e   :  { %v931_v50 = vpop.f32.mrf.mxu3 }
 0x376   :  { %v1120_v53 = vpop.f32.mrf.mxu3 }
 0x37e   :  { %v1123_v35 = vpop.f32.mrf.mxu3 }
 0x386   :  { %v1126_v29 = vpop.f32.mrf.mxu3 }
 0x38e   :  { %v1129_v14 = vpop.f32.mrf.mxu3 }
 0x38f   :  { %v1010_v32 = vpop.f32.mrf.mxu1 }
 0x397   :  { %v1013_v17 = vpop.f32.mrf.mxu1 }
 0x39f   :  { %v1016_v55 = vpop.f32.mrf.mxu1 }
 0x3a7   :  { %v951_v33 = vpop.f32.mrf.mxu0  ;;  %v1019_v4 = vpop.f32.mrf.mxu1 }
 0x3a8   :  { %v952_v58 = vadd.f32 %v951_v33, %v922_v10 }
 0x3a9   :  { %v1071_v34 = vpop.f32.mrf.mxu2 }
 0x3aa   :  { %v1022_v54 = vadd.f32 %v1010_v32, %v952_v58 }
 0x3ac   :  { %v1083_v40 = vadd.f32 %v1071_v34, %v1022_v54 }
 0x3ae   :  { %v1132_v47 = vadd.f32 %v1120_v53, %v1083_v40 }
 0x3af   :  { %v954_v31 = vpop.f32.mrf.mxu0  ;;  %v1254_v43 = vpop.f32.mrf.mxu1 }
 0x3b0   :  { %v955_v41 = vadd.f32 %v954_v31, %v925_v52 }
 0x3b1   :  { %v1074_v21 = vpop.f32.mrf.mxu2 }
 0x3b2   :  { %v1023_v45 = vadd.f32 %v1013_v17, %v955_v41 }
 0x3b4   :  { %v1084_v60 = vadd.f32 %v1074_v21, %v1023_v45 }
 0x3b6   :  { %v1133_v7 = vadd.f32 %v1123_v35, %v1084_v60 }
 0x3b7   :  { %v957_v57 = vpop.f32.mrf.mxu0  ;;  %v1257_v63 = vpop.f32.mrf.mxu1 }
 0x3b8   :  { %v958_v62 = vadd.f32 %v957_v57, %v928_v27 }
 0x3b9   :  { %v1077_v36 = vpop.f32.mrf.mxu2 }
 0x3ba   :  { %v1024_v0 = vadd.f32 %v1016_v55, %v958_v62 }
 0x3bc   :  { %v1085_v15 = vadd.f32 %v1077_v36, %v1024_v0 }
 0x3be   :  { %v1134_v19 = vadd.f32 %v1126_v29, %v1085_v15 }
 0x3bf   :  { %v960_v38 = vpop.f32.mrf.mxu0  ;;  %v1260_v22 = vpop.f32.mrf.mxu1 }
 0x3c0   :  { %v961_v42 = vadd.f32 %v960_v38, %v931_v50 }
 0x3c1   :  { %v1080_v59 = vpop.f32.mrf.mxu2 }
 0x3c2   :  { %v1025_v1 = vadd.f32 %v1019_v4, %v961_v42 }
 0x3c4   :  { %v1086_v28 = vadd.f32 %v1080_v59, %v1025_v1  ;;  %v1477_v1 = vld [vmem:[%s2311_s6] sm:$0x1]  ;;  %s1778_s6 = smov [#allocation10]  }
 0x3c5   :  { %s1504_s10 = sshll.u32 %s1778_s6, 4  ;;  %s1505_s10 = int_to_ptr.vmem [resolvable:$true] %s1504_s10 }
 0x3c6   :  { %v1135_v56 = vadd.f32 %v1129_v14, %v1086_v28 }
 0x3c7   :  { %v1181_v37 = vpop.f32.mrf.mxu0  ;;  %v1263_v25 = vpop.f32.mrf.mxu1 }
 0x3c8   :  { %v1193_v49 = vadd.f32 %v1181_v37, %v1132_v47 }
 0x3c9   :  { %v1303_v9 = vpop.f32.mrf.mxu2 }
 0x3ca   :  { %v1266_v3 = vadd.f32 %v1254_v43, %v1193_v49 }
 0x3cc   :  { %v1315_v61 = vadd.f32 %v1303_v9, %v1266_v3 }
 0x3ce   :  { %v1364_v2 = vpop.f32.mrf.mxu3 }
 0x3cf   :  { %v1376_v5 = vadd.f32 %v1364_v2, %v1315_v61  ;;  %v1184_v8 = vpop.f32.mrf.mxu0 }
 0x3d0   :  { %v1194_v51 = vadd.f32 %v1184_v8, %v1133_v7 }
 0x3d1   :  { %1396 = vmatmul.f32.vlgmr.msrb.gmra.mxu0 %v1376_v5  ;;  %v1306_v18 = vpop.f32.mrf.mxu2 }
 0x3d2   :  { %v1267_v44 = vadd.f32 %v1257_v63, %v1194_v51 }
 0x3d4   :  { %v1316_v11 = vadd.f32 %v1306_v18, %v1267_v44 }
 0x3d6   :  { %v1367_v48 = vpop.f32.mrf.mxu3 }
 0x3d7   :  { %v1377_v16 = vadd.f32 %v1367_v48, %v1316_v11  ;;  %v1187_v12 = vpop.f32.mrf.mxu0 }
 0x3d8   :  { %v1195_v23 = vadd.f32 %v1187_v12, %v1134_v19  ;;  %v1620_v12 = vld [vmem:[%s2312_s7] ss:$0 sm:$0xff] }
 0x3d9   :  { %1399 = vmatmul.f32.gmra.mxu0 %v1377_v16  ;;  %v1309_v46 = vpop.f32.mrf.mxu2 }
 0x3da   :  { %v1268_v13 = vadd.f32 %v1260_v22, %v1195_v23 }
 0x3dc   :  { %v1317_v30 = vadd.f32 %v1309_v46, %v1268_v13 }
 0x3de   :  { %v1370_v6 = vpop.f32.mrf.mxu3 }
 0x3df   :  { %v1378_v39 = vadd.f32 %v1370_v6, %v1317_v30  ;;  %v1190_v20 = vpop.f32.mrf.mxu0 }
 0x3e0   :  { %v1196_v24 = vadd.f32 %v1190_v20, %v1135_v56 }
 0x3e1   :  { %1402 = vmatmul.f32.vlgmr.msrb.gmra.mxu2 %v1378_v39  ;;  %v1312_v10 = vpop.f32.mrf.mxu2 }
 0x3e2   :  { %v1269_v26 = vadd.f32 %v1263_v25, %v1196_v24 }
 0x3e4   :  { %v1318_v52 = vadd.f32 %v1312_v10, %v1269_v26 }
 0x3e6   :  { %v1373_v27 = vpop.f32.mrf.mxu3 }
 0x3e7   :  { %v1379_v32 = vadd.f32 %v1373_v27, %v1318_v52 }
 0x3e9   :  { %1405 = vmatmul.f32.gmra.mxu2 %v1379_v32 }
 0x44e   :  { %v1397_v50 = vpop.f32.mrf.mxu0 }
 0x456   :  { %v1400_v33 = vpop.f32.mrf.mxu0 }
 0x457   :  { %v1409_v53 = vadd.f32 %v1400_v33, %v1397_v50 }
 0x464   :  { %v1403_v17 = vpop.f32.mrf.mxu2 }
 0x465   :  { %v1410_v34 = vadd.f32 %v1409_v53, %v1403_v17 }
 0x46c   :  { %v1406_v31 = vpop.f32.mrf.mxu2 }
 0x46d   :  { %v1411_v55 = vadd.f32 %v1410_v34, %v1406_v31 }
 0x46f   :  { %v1412_v21 = vrot.slane %v1411_v55, 4 }
 0x471   :  { %v1413_v35 = vadd.f32 %v1412_v21, %v1411_v55 }
 0x473   :  { %v1414_v57 = vrot.slane %v1413_v35, 2 }
 0x475   :  { %v1415_v36 = vadd.f32 %v1414_v57, %v1413_v35 }
 0x477   :  { %v1416_v4 = vrot.slane %v1415_v36, 1 }
 0x479   :  { %v1417_v58 = vadd.f32 %v1416_v4, %v1415_v36 }
 0x47b   :  { %v1418_v29 = vmul.f32 0.001953125, %v1417_v58 }
 0x47d   :  { %v1419_v54 = vsub.f32 %v1376_v5, %v1418_v29  ;;  %v1421_v38 = vsub.f32 %v1378_v39, %v1418_v29  ;;  %v1420_v41 = vsub.f32 %v1377_v16, %v1418_v29  ;;  %v1422_v43 = vsub.f32 %v1379_v32, %v1418_v29 }
 0x47f   :  { %v1423_v59 = vmul.f32 %v1419_v54, %v1419_v54  ;;  %v1425_v40 = vmul.f32 %v1421_v38, %v1421_v38  ;;  %v1424_v14 = vmul.f32 %v1420_v41, %v1420_v41  ;;  %v1426_v45 = vmul.f32 %v1422_v43, %v1422_v43 }
 0x481   :  { %1443 = vmatmul.f32.vlgmr.msrb.gmra.mxu1 %v1423_v59  ;;  %1449 = vmatmul.f32.vlgmr.msrb.gmra.mxu3 %v1425_v40 }
 0x489   :  { %1446 = vmatmul.f32.gmra.mxu1 %v1424_v14  ;;  %1452 = vmatmul.f32.gmra.mxu3 %v1426_v45 }
 0x4fe   :  { %v1444_v47 = vpop.f32.mrf.mxu1 }
 0x504   :  { %v1450_v37 = vpop.f32.mrf.mxu3 }
 0x506   :  { %v1447_v49 = vpop.f32.mrf.mxu1 }
 0x507   :  { %v1456_v9 = vadd.f32 %v1447_v49, %v1444_v47 }
 0x509   :  { %v1457_v60 = vadd.f32 %v1456_v9, %v1450_v37 }
 0x50c   :  { %v1453_v62 = vpop.f32.mrf.mxu3 }
 0x50d   :  { %v1458_v3 = vadd.f32 %v1457_v60, %v1453_v62 }
 0x50f   :  { %v1459_v61 = vrot.slane %v1458_v3, 4 }
 0x511   :  { %v1460_v63 = vadd.f32 %v1459_v61, %v1458_v3 }
 0x513   :  { %v1461_v2 = vrot.slane %v1460_v63, 2 }
 0x515   :  { %v1462_v0 = vadd.f32 %v1461_v2, %v1460_v63 }
 0x517   :  { %v1463_v5 = vrot.slane %v1462_v0, 1 }
 0x519   :  { %v1464_v7 = vadd.f32 %v1463_v5, %v1462_v0 }
 0x51b   :  { %v1465_v8 = vmul.f32 0.001953125, %v1464_v7 }
 0x51d   :  { %v1466_v51 = vadd.f32 1e-05, %v1465_v8 }
 0x51f   :  { %1623 = vrsqrt.f32 %v1466_v51  ;;  %vm1473_vm14 = vweird.f32 %v1466_v51 }
 0x525   :  { %v1624_v18 = vpop.eup %1623 }
 0x526   :  { %v1468_v15 = vmul.f32 %v1624_v18, %v1466_v51  ;;  %vm1474_vm13 = vweird.f32 %v1624_v18 }
 0x527   :  { %vm1475_vm15 = vmor %vm1473_vm14, %vm1474_vm13 }
 0x528   :  { %v1469_v42 = vmul.f32 %v1624_v18, %v1468_v15 }
 0x52a   :  { %v1470_v44 = vmul.f32 0.5, %v1469_v42 }
 0x52c   :  { %v1471_v11 = vsub.f32 1.5, %v1470_v44 }
 0x52e   :  { %v1472_v48 = vmul.f32 %v1624_v18, %v1471_v11 }
 0x530   :  { %v1476_v16 = vsel %vm1475_vm15, %v1624_v18, %v1472_v48 }
 0x531   :  { %v1478_v19 = vmul.f32 %v1477_v1, %v1476_v16 }
 0x533   :  { %v1479_v22 = vperm.slane %v1478_v19, 0 }
 0x535   :  { %v1480_v23 = vmul.f32 %v1479_v22, %v1419_v54  ;;  %v1481_v46 = vmul.f32 %v1479_v22, %v1420_v41  ;;  %v1482_v28 = vmul.f32 %v1479_v22, %v1421_v38  ;;  %v1483_v13 = vmul.f32 %v1479_v22, %v1422_v43 }
 0x537   :  { %v1488_v30 = vadd.f32 %v1620_v12, %v1480_v23  ;;  %v1489_v6 = vadd.f32 %v1620_v12, %v1481_v46  ;;  %v1490_v39 = vadd.f32 %v1620_v12, %v1482_v28  ;;  %v1491_v56 = vadd.f32 %v1620_v12, %v1483_v13 }
 0x539   :  { %v1492_v20 = vmax.f32 %v1488_v30, 0.0  ;;  %v1493_v24 = vmax.f32 %v1489_v6, 0.0  ;;  %v1494_v25 = vmax.f32 %v1490_v39, 0.0  ;;  %v1495_v26 = vmax.f32 %v1491_v56, 0.0 }
 0x53b   :  { %1496 = vst [vmem:[#allocation10] sm:$0xff] %v1492_v20 }
 0x53c   :  { %1497 = vst [vmem:[#allocation10 + $0x8] sm:$0xff] %v1493_v24 }
 0x53d   :  { %1498 = vst [vmem:[#allocation10 + $0x10] sm:$0xff] %v1494_v25 }
 0x53e   :  { %1499 = vst [vmem:[#allocation10 + $0x18] sm:$0xff] %v1495_v26 }
 0x53f   :  { %1512 = dma.vmem_to_hbm [thread:$0]  %s1505_s10, 512, %s1507_s15, [#allocation4], %s1770_s13, %s1770_s13, %s1771_s14  }
 0x540   :  { %1767 = dma.done.wait [#allocation4], 512  }
 0x541   :  { %1768 = vsyncadd [#allocation4], 4294966784 }
 0x542   :  { %1517 = vsyncpa [#allocation3], 1 }
 0x543   :  { %1518 = vsyncpa [#allocation6], 1 }
 0x544   :  { %1519 = vsyncpa [#allocation9], 1 }
 0x545   :  { %1520 = vsyncpa [#allocation4], 1 }

</bundles_post_ra>
